<compile_context>
chip_gen: v7x
topology: tpu7x:2x2x1
jax: 0.10.0
libtpu: 0.0.40
codegen_flags: <defaults>
</compile_context>

<pallas_src>
import jax
import jax.numpy as jnp
import numpy as np
from jax.experimental import pallas as pl
from jax.experimental.pallas import tpu as pltpu

MAX_DISP = 192.0
A = 0.8
C = 0.5

_TARGET_BLOCK_ROWS = 128  # pooled-output rows per grid step (sublane-major tile)


def _pick_block_rows(rows: int, target: int = _TARGET_BLOCK_ROWS) -> int:
    """Largest divisor of `rows` that is <= target and sublane-friendly."""
    for d in range(min(target, rows), 0, -1):
        if rows % d == 0 and (d % 8 == 0 or d == rows):
            return d
    return rows


def _make_scale_kernel(scale, a, c, max_disp, emit_pooled):
    abs_a_sub_2 = abs(a - 2.0)
    inv_c = 1.0 / c
    inv_abs = 1.0 / abs_a_sub_2
    half_a = a * 0.5
    post = abs_a_sub_2 / a

    def body(d_ref, p_ref, pooled_ref, num_ref, den_ref):
        # d_ref: (BR, scale, Wo) -- the `scale` window rows of BR pooled rows,
        #        already max-reduced along W outside the kernel.
        # p_ref: (BR, Wo) prediction at this scale.
        # Row-direction window max: unrolled maximum over the middle axis
        # (pure VPU, no cross-lane work).
        d = d_ref[:, 0, :]
        for k in range(1, scale):
            d = jnp.maximum(d, d_ref[:, k, :])
        if pooled_ref is not None:
            pooled_ref[...] = d          # carried to the next scale

        p = p_ref[...]
        mask = jnp.logical_and(d < max_disp, d > 0.001)

        # robust_loss(|pred - d|, a, c); argument of log is >= 1, exp/log on EUP.
        x = jnp.abs(p - d) * inv_c
        x = x * x * inv_abs + 1.0
        x = jnp.exp(half_a * jnp.log(x))
        x = (x - 1.0) * post

        # Per-lane partial sums (sublane reduce only); final reduce is in JAX.
        num_ref[0] = jnp.sum(jnp.where(mask, x, 0.0), axis=0, keepdims=True)
        den_ref[0] = jnp.sum(jnp.where(mask, 1.0, 0.0), axis=0, keepdims=True)

    if emit_pooled:
        def kernel(d_ref, p_ref, pooled_ref, num_ref, den_ref):
            body(d_ref, p_ref, pooled_ref, num_ref, den_ref)
    else:
        def kernel(d_ref, p_ref, num_ref, den_ref):
            body(d_ref, p_ref, None, num_ref, den_ref)
    return kernel


def _scale_loss_call(d_win, pred2, scale, a, c, max_disp, emit_pooled):
    rows, s, wo = d_win.shape
    assert s == scale and pred2.shape == (rows, wo)
    br = _pick_block_rows(rows)
    grid_m = rows // br

    in_specs = [
        pl.BlockSpec((br, scale, wo), lambda i: (i, 0, 0)),
        pl.BlockSpec((br, wo), lambda i: (i, 0)),
    ]
    out_shapes, out_specs = [], []
    if emit_pooled:
        out_shapes.append(jax.ShapeDtypeStruct((rows, wo), jnp.float32))
        out_specs.append(pl.BlockSpec((br, wo), lambda i: (i, 0)))
    for _ in range(2):  # num / den partials: one lane-dense row per grid step
        out_shapes.append(jax.ShapeDtypeStruct((grid_m, 1, wo), jnp.float32))
        out_specs.append(pl.BlockSpec((1, 1, wo), lambda i: (i, 0, 0)))

    outs = pl.pallas_call(
        _make_scale_kernel(scale, a, c, max_disp, emit_pooled),
        out_shape=tuple(out_shapes),
        grid=(grid_m,),
        in_specs=in_specs,
        out_specs=tuple(out_specs),
        compiler_params=pltpu.CompilerParams(
            dimension_semantics=("parallel",)),
    )(d_win, pred2)

    if emit_pooled:
        pooled, num_p, den_p = outs
    else:
        pooled, (num_p, den_p) = None, outs
    loss = jnp.sum(num_p) / (jnp.sum(den_p) + 1e-6)
    return pooled, loss


def _multi_scale_loss_impl(preds, disp, max_disp, a, c):
    losses = {}
    d = disp.astype(jnp.float32)          # current-resolution disparity (NCHW)
    scale_preds = preds["multi_scale"]
    n_scales = len(scale_preds)
    # TODO(synk): fuse all scales into a single pallas_call (keep the pooled
    # disparity in VMEM scratch between phases) to drop per-scale launch
    # overhead and the pooled HBM round trip.
    for idx, pred in enumerate(scale_preds):
        pred = pred.astype(jnp.float32)
        n, ch, h, w = d.shape
        scale = w // pred.shape[3]
        ho, wo = h // scale, w // scale
        is_last = idx == n_scales - 1

        if scale > 1:
            # Column-direction (W) window max: contiguous minor-axis grouped
            # reduce in XLA (no transpose, no im2col slab).
            # TODO(synk): fold this lane-direction pool into the kernel too
            # (needs lane-strided loads) to save one pooled-width HBM pass.
            dcol = d.reshape(n, ch, h, wo, scale).max(axis=-1)   # (N, C, H, Wo)
        else:
            dcol = d
        d_win = dcol.reshape(n * ch * ho, scale, wo)             # free reshape
        pred2 = pred.reshape(n * ch * ho, wo)                    # free reshape

        emit_pooled = (scale > 1) and (not is_last)
        pooled, loss = _scale_loss_call(d_win, pred2, scale, a, c, max_disp,
                                        emit_pooled)
        losses[f"disp_loss_{idx}"] = loss

        if not is_last and scale > 1:
            d = pooled.reshape(n, ch, ho, wo)   # carry pooled disp to next scale
        # scale == 1: max_pool2d(k=1, s=1) is the identity -> carry d unchanged.
    return losses


multi_scale_loss = jax.jit(
    lambda preds, disp: _multi_scale_loss_impl(preds, disp, MAX_DISP, A, C))


def multi_scale_loss_ref(preds, disp, max_disp=MAX_DISP, a=A, c=C):
    # Pure-JAX reference mirroring the PyTorch module exactly.
    abs_a_sub_2 = abs(a - 2.0)
    losses = {}
    d = disp.astype(jnp.float32)
    for idx, pred in enumerate(preds["multi_scale"]):
        scale = d.shape[3] // pred.shape[3]
        n, ch, h, w = d.shape
        d = d.reshape(n, ch, h // scale, scale, w // scale, scale).max(axis=(3, 5))
        mask = (d < max_disp) & (d > 0.001)
        x = jnp.abs(pred - d) / c
        x = x * x / abs_a_sub_2 + 1.0
        x = x ** (a / 2.0)
        x = (x - 1.0) * abs_a_sub_2 / a
        losses[f"disp_loss_{idx}"] = (x * mask).sum() / (mask.sum() + 1e-6)
    return losses


if __name__ == "__main__":
    key = jax.random.PRNGKey(0)
    k_disp, k0, k1, k2 = jax.random.split(key, 4)

    # Ground-truth disparity (N, C, H, W) = (2, 1, 16, 16); values straddle the
    # (0.001, 192) validity window so the mask is non-trivial.
    disp = jax.random.uniform(k_disp, (2, 1, 16, 16), jnp.float32, -10.0, 250.0)

    # Multi-scale predictions at 1/1, 1/2, 1/4 resolution (NCHW).
    preds = {
        "multi_scale": [
            jax.random.uniform(k0, (2, 1, 16, 16), jnp.float32, 0.0, 200.0),
            jax.random.uniform(k1, (2, 1, 8, 8), jnp.float32, 0.0, 200.0),
            jax.random.uniform(k2, (2, 1, 4, 4), jnp.float32, 0.0, 200.0),
        ]
    }

    out = multi_scale_loss(preds, disp)
    out = {k: jax.block_until_ready(v) for k, v in out.items()}

    ref = multi_scale_loss_ref(preds, disp)
    for k in ref:
        np.testing.assert_allclose(np.asarray(out[k]), np.asarray(ref[k]),
                                   rtol=1e-4, atol=1e-5)

    print("KERNEL_OK")
</pallas_src>

<mosaic_0001>
module attributes {stable_mosaic.version = 11 : i64} {
  func.func @kernel(%arg0: i32, %arg1: memref<16x2x8xf32, #tpu.memory_space<vmem>>, %arg2: memref<16x8xf32, #tpu.memory_space<vmem>>, %arg3: memref<16x8xf32, #tpu.memory_space<vmem>>, %arg4: memref<1x1x8xf32, #tpu.memory_space<vmem>>, %arg5: memref<1x1x8xf32, #tpu.memory_space<vmem>>) attributes {dimension_semantics = [#tpu.dimension_semantics<parallel>], iteration_bounds = array<i64: 1>, scalar_prefetch = 0 : i64, scratch_operands = 0 : i64, tpu.core_type = #tpu.core_type<tc>, window_params = [{transform_indices = @transform_0, window_bounds = array<i64: 16, 2, 8>}, {transform_indices = @transform_1, window_bounds = array<i64: 16, 8>}, {transform_indices = @transform_2, window_bounds = array<i64: 16, 8>}, {transform_indices = @transform_3, window_bounds = array<i64: 1, 1, 8>}, {transform_indices = @transform_4, window_bounds = array<i64: 1, 1, 8>}]} {
    %c0 = arith.constant 0 : index
    %c0_0 = arith.constant 0 : index
    %c0_1 = arith.constant 0 : index
    %0 = vector.load %arg1[%c0, %c0_0, %c0_1] : memref<16x2x8xf32, #tpu.memory_space<vmem>>, vector<16x1x8xf32>
    %1 = vector.shape_cast %0 : vector<16x1x8xf32> to vector<16x8xf32>
    %c0_2 = arith.constant 0 : index
    %c1 = arith.constant 1 : index
    %c0_3 = arith.constant 0 : index
    %2 = vector.load %arg1[%c0_2, %c1, %c0_3] : memref<16x2x8xf32, #tpu.memory_space<vmem>>, vector<16x1x8xf32>
    %3 = vector.shape_cast %2 : vector<16x1x8xf32> to vector<16x8xf32>
    %4 = arith.maximumf %1, %3 : vector<16x8xf32>
    %c0_4 = arith.constant 0 : index
    %c0_5 = arith.constant 0 : index
    %5 = vector.load %arg3[%c0_4, %c0_5] : memref<16x8xf32, #tpu.memory_space<vmem>>, vector<16x8xf32>
    tpu.vector_store %arg3[%c0_4, %c0_5], %4 {strides = array<i32>} : memref<16x8xf32, #tpu.memory_space<vmem>>, vector<16x8xf32>,
    %c0_6 = arith.constant 0 : index
    %c0_7 = arith.constant 0 : index
    %6 = vector.load %arg2[%c0_6, %c0_7] : memref<16x8xf32, #tpu.memory_space<vmem>>, vector<16x8xf32>
    %cst = arith.constant 1.920000e+02 : f32
    %7 = vector.broadcast %cst : f32 to vector<16x8xf32>
    %8 = arith.cmpf olt, %4, %7 : vector<16x8xf32>
    %cst_8 = arith.constant 1.000000e-03 : f32
    %9 = vector.broadcast %cst_8 : f32 to vector<16x8xf32>
    %10 = arith.cmpf ogt, %4, %9 : vector<16x8xf32>
    %11 = arith.andi %8, %10 : vector<16x8xi1>
    %12 = arith.subf %6, %4 : vector<16x8xf32>
    %13 = math.absf %12 : vector<16x8xf32>
    %cst_9 = arith.constant 2.000000e+00 : f32
    %14 = vector.broadcast %cst_9 : f32 to vector<16x8xf32>
    %15 = arith.mulf %13, %14 : vector<16x8xf32>
    %16 = arith.mulf %15, %15 : vector<16x8xf32>
    %cst_10 = arith.constant 0.833333313 : f32
    %17 = vector.broadcast %cst_10 : f32 to vector<16x8xf32>
    %18 = arith.mulf %16, %17 : vector<16x8xf32>
    %cst_11 = arith.constant 1.000000e+00 : f32
    %19 = vector.broadcast %cst_11 : f32 to vector<16x8xf32>
    %20 = arith.addf %18, %19 : vector<16x8xf32>
    %21 = math.log %20 : vector<16x8xf32>
    %cst_12 = arith.constant 4.000000e-01 : f32
    %22 = vector.broadcast %cst_12 : f32 to vector<16x8xf32>
    %23 = arith.mulf %22, %21 : vector<16x8xf32>
    %24 = math.exp %23 : vector<16x8xf32>
    %cst_13 = arith.constant 1.000000e+00 : f32
    %25 = vector.broadcast %cst_13 : f32 to vector<16x8xf32>
    %26 = arith.subf %24, %25 : vector<16x8xf32>
    %cst_14 = arith.constant 1.500000e+00 : f32
    %27 = vector.broadcast %cst_14 : f32 to vector<16x8xf32>
    %28 = arith.mulf %26, %27 : vector<16x8xf32>
    %cst_15 = arith.constant 0.000000e+00 : f32
    %29 = vector.broadcast %cst_15 : f32 to vector<16x8xf32>
    %30 = arith.select %11, %28, %29 : vector<16x8xi1>, vector<16x8xf32>
    %cst_16 = arith.constant dense<0.000000e+00> : vector<8xf32>
    %31 = vector.multi_reduction <add>, %30, %cst_16 [0] : vector<16x8xf32> to vector<8xf32>
    %32 = vector.shape_cast %31 : vector<8xf32> to vector<1x8xf32>
    %c0_17 = arith.constant 0 : index
    %c0_18 = arith.constant 0 : index
    %c0_19 = arith.constant 0 : index
    %33 = vector.load %arg4[%c0_17, %c0_18, %c0_19] : memref<1x1x8xf32, #tpu.memory_space<vmem>>, vector<1x1x8xf32>
    %34 = vector.shape_cast %33 : vector<1x1x8xf32> to vector<1x8xf32>
    %35 = vector.shape_cast %32 : vector<1x8xf32> to vector<1x1x8xf32>
    tpu.vector_store %arg4[%c0_17, %c0_18, %c0_19], %35 {strides = array<i32>} : memref<1x1x8xf32, #tpu.memory_space<vmem>>, vector<1x1x8xf32>,
    %cst_20 = arith.constant 1.000000e+00 : f32
    %cst_21 = arith.constant 0.000000e+00 : f32
    %36 = vector.broadcast %cst_20 : f32 to vector<16x8xf32>
    %37 = vector.broadcast %cst_21 : f32 to vector<16x8xf32>
    %38 = arith.select %11, %36, %37 : vector<16x8xi1>, vector<16x8xf32>
    %cst_22 = arith.constant dense<0.000000e+00> : vector<8xf32>
    %39 = vector.multi_reduction <add>, %38, %cst_22 [0] : vector<16x8xf32> to vector<8xf32>
    %40 = vector.shape_cast %39 : vector<8xf32> to vector<1x8xf32>
    %c0_23 = arith.constant 0 : index
    %c0_24 = arith.constant 0 : index
    %c0_25 = arith.constant 0 : index
    %41 = vector.load %arg5[%c0_23, %c0_24, %c0_25] : memref<1x1x8xf32, #tpu.memory_space<vmem>>, vector<1x1x8xf32>
    %42 = vector.shape_cast %41 : vector<1x1x8xf32> to vector<1x8xf32>
    %43 = vector.shape_cast %40 : vector<1x8xf32> to vector<1x1x8xf32>
    tpu.vector_store %arg5[%c0_23, %c0_24, %c0_25], %43 {strides = array<i32>} : memref<1x1x8xf32, #tpu.memory_space<vmem>>, vector<1x1x8xf32>,
    return
  }
  func.func @transform_0(%arg0: i32) -> (i32, i32, i32) {
    %c0_i32 = arith.constant 0 : i32
    %c0_i32_0 = arith.constant 0 : i32
    %c0_i32_1 = arith.constant 0 : i32
    return %arg0, %c0_i32, %c0_i32_0 : i32, i32, i32
  }
  func.func @transform_1(%arg0: i32) -> (i32, i32) {
    %c0_i32 = arith.constant 0 : i32
    %c0_i32_0 = arith.constant 0 : i32
    return %arg0, %c0_i32 : i32, i32
  }
  func.func @transform_2(%arg0: i32) -> (i32, i32) {
    %c0_i32 = arith.constant 0 : i32
    %c0_i32_0 = arith.constant 0 : i32
    return %arg0, %c0_i32 : i32, i32
  }
  func.func @transform_3(%arg0: i32) -> (i32, i32, i32) {
    %c0_i32 = arith.constant 0 : i32
    %c0_i32_0 = arith.constant 0 : i32
    %c0_i32_1 = arith.constant 0 : i32
    return %arg0, %c0_i32, %c0_i32_0 : i32, i32, i32
  }
  func.func @transform_4(%arg0: i32) -> (i32, i32, i32) {
    %c0_i32 = arith.constant 0 : i32
    %c0_i32_0 = arith.constant 0 : i32
    %c0_i32_1 = arith.constant 0 : i32
    return %arg0, %c0_i32, %c0_i32_0 : i32, i32, i32
  }
}

module attributes {stable_mosaic.version = 11 : i64} {
  func.func @kernel(%arg0: i32, %arg1: memref<8x2x4xf32, #tpu.memory_space<vmem>>, %arg2: memref<8x4xf32, #tpu.memory_space<vmem>>, %arg3: memref<1x1x4xf32, #tpu.memory_space<vmem>>, %arg4: memref<1x1x4xf32, #tpu.memory_space<vmem>>) attributes {dimension_semantics = [#tpu.dimension_semantics<parallel>], iteration_bounds = array<i64: 1>, scalar_prefetch = 0 : i64, scratch_operands = 0 : i64, tpu.core_type = #tpu.core_type<tc>, window_params = [{transform_indices = @transform_0, window_bounds = array<i64: 8, 2, 4>}, {transform_indices = @transform_1, window_bounds = array<i64: 8, 4>}, {transform_indices = @transform_2, window_bounds = array<i64: 1, 1, 4>}, {transform_indices = @transform_3, window_bounds = array<i64: 1, 1, 4>}]} {
    %c0 = arith.constant 0 : index
    %c0_0 = arith.constant 0 : index
    %c0_1 = arith.constant 0 : index
    %0 = vector.load %arg1[%c0, %c0_0, %c0_1] : memref<8x2x4xf32, #tpu.memory_space<vmem>>, vector<8x1x4xf32>
    %1 = vector.shape_cast %0 : vector<8x1x4xf32> to vector<8x4xf32>
    %c0_2 = arith.constant 0 : index
    %c1 = arith.constant 1 : index
    %c0_3 = arith.constant 0 : index
    %2 = vector.load %arg1[%c0_2, %c1, %c0_3] : memref<8x2x4xf32, #tpu.memory_space<vmem>>, vector<8x1x4xf32>
    %3 = vector.shape_cast %2 : vector<8x1x4xf32> to vector<8x4xf32>
    %4 = arith.maximumf %1, %3 : vector<8x4xf32>
    %c0_4 = arith.constant 0 : index
    %c0_5 = arith.constant 0 : index
    %5 = vector.load %arg2[%c0_4, %c0_5] : memref<8x4xf32, #tpu.memory_space<vmem>>, vector<8x4xf32>
    %cst = arith.constant 1.920000e+02 : f32
    %6 = vector.broadcast %cst : f32 to vector<8x4xf32>
    %7 = arith.cmpf olt, %4, %6 : vector<8x4xf32>
    %cst_6 = arith.constant 1.000000e-03 : f32
    %8 = vector.broadcast %cst_6 : f32 to vector<8x4xf32>
    %9 = arith.cmpf ogt, %4, %8 : vector<8x4xf32>
    %10 = arith.andi %7, %9 : vector<8x4xi1>
    %11 = arith.subf %5, %4 : vector<8x4xf32>
    %12 = math.absf %11 : vector<8x4xf32>
    %cst_7 = arith.constant 2.000000e+00 : f32
    %13 = vector.broadcast %cst_7 : f32 to vector<8x4xf32>
    %14 = arith.mulf %12, %13 : vector<8x4xf32>
    %15 = arith.mulf %14, %14 : vector<8x4xf32>
    %cst_8 = arith.constant 0.833333313 : f32
    %16 = vector.broadcast %cst_8 : f32 to vector<8x4xf32>
    %17 = arith.mulf %15, %16 : vector<8x4xf32>
    %cst_9 = arith.constant 1.000000e+00 : f32
    %18 = vector.broadcast %cst_9 : f32 to vector<8x4xf32>
    %19 = arith.addf %17, %18 : vector<8x4xf32>
    %20 = math.log %19 : vector<8x4xf32>
    %cst_10 = arith.constant 4.000000e-01 : f32
    %21 = vector.broadcast %cst_10 : f32 to vector<8x4xf32>
    %22 = arith.mulf %21, %20 : vector<8x4xf32>
    %23 = math.exp %22 : vector<8x4xf32>
    %cst_11 = arith.constant 1.000000e+00 : f32
    %24 = vector.broadcast %cst_11 : f32 to vector<8x4xf32>
    %25 = arith.subf %23, %24 : vector<8x4xf32>
    %cst_12 = arith.constant 1.500000e+00 : f32
    %26 = vector.broadcast %cst_12 : f32 to vector<8x4xf32>
    %27 = arith.mulf %25, %26 : vector<8x4xf32>
    %cst_13 = arith.constant 0.000000e+00 : f32
    %28 = vector.broadcast %cst_13 : f32 to vector<8x4xf32>
    %29 = arith.select %10, %27, %28 : vector<8x4xi1>, vector<8x4xf32>
    %cst_14 = arith.constant dense<0.000000e+00> : vector<4xf32>
    %30 = vector.multi_reduction <add>, %29, %cst_14 [0] : vector<8x4xf32> to vector<4xf32>
    %31 = vector.shape_cast %30 : vector<4xf32> to vector<1x4xf32>
    %c0_15 = arith.constant 0 : index
    %c0_16 = arith.constant 0 : index
    %c0_17 = arith.constant 0 : index
    %32 = vector.load %arg3[%c0_15, %c0_16, %c0_17] : memref<1x1x4xf32, #tpu.memory_space<vmem>>, vector<1x1x4xf32>
    %33 = vector.shape_cast %32 : vector<1x1x4xf32> to vector<1x4xf32>
    %34 = vector.shape_cast %31 : vector<1x4xf32> to vector<1x1x4xf32>
    tpu.vector_store %arg3[%c0_15, %c0_16, %c0_17], %34 {strides = array<i32>} : memref<1x1x4xf32, #tpu.memory_space<vmem>>, vector<1x1x4xf32>,
    %cst_18 = arith.constant 1.000000e+00 : f32
    %cst_19 = arith.constant 0.000000e+00 : f32
    %35 = vector.broadcast %cst_18 : f32 to vector<8x4xf32>
    %36 = vector.broadcast %cst_19 : f32 to vector<8x4xf32>
    %37 = arith.select %10, %35, %36 : vector<8x4xi1>, vector<8x4xf32>
    %cst_20 = arith.constant dense<0.000000e+00> : vector<4xf32>
    %38 = vector.multi_reduction <add>, %37, %cst_20 [0] : vector<8x4xf32> to vector<4xf32>
    %39 = vector.shape_cast %38 : vector<4xf32> to vector<1x4xf32>
    %c0_21 = arith.constant 0 : index
    %c0_22 = arith.constant 0 : index
    %c0_23 = arith.constant 0 : index
    %40 = vector.load %arg4[%c0_21, %c0_22, %c0_23] : memref<1x1x4xf32, #tpu.memory_space<vmem>>, vector<1x1x4xf32>
    %41 = vector.shape_cast %40 : vector<1x1x4xf32> to vector<1x4xf32>
    %42 = vector.shape_cast %39 : vector<1x4xf32> to vector<1x1x4xf32>
    tpu.vector_store %arg4[%c0_21, %c0_22, %c0_23], %42 {strides = array<i32>} : memref<1x1x4xf32, #tpu.memory_space<vmem>>, vector<1x1x4xf32>,
    return
  }
  func.func @transform_0(%arg0: i32) -> (i32, i32, i32) {
    %c0_i32 = arith.constant 0 : i32
    %c0_i32_0 = arith.constant 0 : i32
    %c0_i32_1 = arith.constant 0 : i32
    return %arg0, %c0_i32, %c0_i32_0 : i32, i32, i32
  }
  func.func @transform_1(%arg0: i32) -> (i32, i32) {
    %c0_i32 = arith.constant 0 : i32
    %c0_i32_0 = arith.constant 0 : i32
    return %arg0, %c0_i32 : i32, i32
  }
  func.func @transform_2(%arg0: i32) -> (i32, i32, i32) {
    %c0_i32 = arith.constant 0 : i32
    %c0_i32_0 = arith.constant 0 : i32
    %c0_i32_1 = arith.constant 0 : i32
    return %arg0, %c0_i32, %c0_i32_0 : i32, i32, i32
  }
  func.func @transform_3(%arg0: i32) -> (i32, i32, i32) {
    %c0_i32 = arith.constant 0 : i32
    %c0_i32_0 = arith.constant 0 : i32
    %c0_i32_1 = arith.constant 0 : i32
    return %arg0, %c0_i32, %c0_i32_0 : i32, i32, i32
  }
}

module attributes {stable_mosaic.version = 11 : i64} {
  func.func @kernel(%arg0: i32, %arg1: memref<32x1x16xf32, #tpu.memory_space<vmem>>, %arg2: memref<32x16xf32, #tpu.memory_space<vmem>>, %arg3: memref<1x1x16xf32, #tpu.memory_space<vmem>>, %arg4: memref<1x1x16xf32, #tpu.memory_space<vmem>>) attributes {dimension_semantics = [#tpu.dimension_semantics<parallel>], iteration_bounds = array<i64: 1>, scalar_prefetch = 0 : i64, scratch_operands = 0 : i64, tpu.core_type = #tpu.core_type<tc>, window_params = [{transform_indices = @transform_0, window_bounds = array<i64: 32, 1, 16>}, {transform_indices = @transform_1, window_bounds = array<i64: 32, 16>}, {transform_indices = @transform_2, window_bounds = array<i64: 1, 1, 16>}, {transform_indices = @transform_3, window_bounds = array<i64: 1, 1, 16>}]} {
    %c0 = arith.constant 0 : index
    %c0_0 = arith.constant 0 : index
    %c0_1 = arith.constant 0 : index
    %0 = vector.load %arg1[%c0, %c0_0, %c0_1] : memref<32x1x16xf32, #tpu.memory_space<vmem>>, vector<32x1x16xf32>
    %1 = vector.shape_cast %0 : vector<32x1x16xf32> to vector<32x16xf32>
    %c0_2 = arith.constant 0 : index
    %c0_3 = arith.constant 0 : index
    %2 = vector.load %arg2[%c0_2, %c0_3] : memref<32x16xf32, #tpu.memory_space<vmem>>, vector<32x16xf32>
    %cst = arith.constant 1.920000e+02 : f32
    %3 = vector.broadcast %cst : f32 to vector<32x16xf32>
    %4 = arith.cmpf olt, %1, %3 : vector<32x16xf32>
    %cst_4 = arith.constant 1.000000e-03 : f32
    %5 = vector.broadcast %cst_4 : f32 to vector<32x16xf32>
    %6 = arith.cmpf ogt, %1, %5 : vector<32x16xf32>
    %7 = arith.andi %4, %6 : vector<32x16xi1>
    %8 = arith.subf %2, %1 : vector<32x16xf32>
    %9 = math.absf %8 : vector<32x16xf32>
    %cst_5 = arith.constant 2.000000e+00 : f32
    %10 = vector.broadcast %cst_5 : f32 to vector<32x16xf32>
    %11 = arith.mulf %9, %10 : vector<32x16xf32>
    %12 = arith.mulf %11, %11 : vector<32x16xf32>
    %cst_6 = arith.constant 0.833333313 : f32
    %13 = vector.broadcast %cst_6 : f32 to vector<32x16xf32>
    %14 = arith.mulf %12, %13 : vector<32x16xf32>
    %cst_7 = arith.constant 1.000000e+00 : f32
    %15 = vector.broadcast %cst_7 : f32 to vector<32x16xf32>
    %16 = arith.addf %14, %15 : vector<32x16xf32>
    %17 = math.log %16 : vector<32x16xf32>
    %cst_8 = arith.constant 4.000000e-01 : f32
    %18 = vector.broadcast %cst_8 : f32 to vector<32x16xf32>
    %19 = arith.mulf %18, %17 : vector<32x16xf32>
    %20 = math.exp %19 : vector<32x16xf32>
    %cst_9 = arith.constant 1.000000e+00 : f32
    %21 = vector.broadcast %cst_9 : f32 to vector<32x16xf32>
    %22 = arith.subf %20, %21 : vector<32x16xf32>
    %cst_10 = arith.constant 1.500000e+00 : f32
    %23 = vector.broadcast %cst_10 : f32 to vector<32x16xf32>
    %24 = arith.mulf %22, %23 : vector<32x16xf32>
    %cst_11 = arith.constant 0.000000e+00 : f32
    %25 = vector.broadcast %cst_11 : f32 to vector<32x16xf32>
    %26 = arith.select %7, %24, %25 : vector<32x16xi1>, vector<32x16xf32>
    %cst_12 = arith.constant dense<0.000000e+00> : vector<16xf32>
    %27 = vector.multi_reduction <add>, %26, %cst_12 [0] : vector<32x16xf32> to vector<16xf32>
    %28 = vector.shape_cast %27 : vector<16xf32> to vector<1x16xf32>
    %c0_13 = arith.constant 0 : index
    %c0_14 = arith.constant 0 : index
    %c0_15 = arith.constant 0 : index
    %29 = vector.load %arg3[%c0_13, %c0_14, %c0_15] : memref<1x1x16xf32, #tpu.memory_space<vmem>>, vector<1x1x16xf32>
    %30 = vector.shape_cast %29 : vector<1x1x16xf32> to vector<1x16xf32>
    %31 = vector.shape_cast %28 : vector<1x16xf32> to vector<1x1x16xf32>
    tpu.vector_store %arg3[%c0_13, %c0_14, %c0_15], %31 {strides = array<i32>} : memref<1x1x16xf32, #tpu.memory_space<vmem>>, vector<1x1x16xf32>,
    %cst_16 = arith.constant 1.000000e+00 : f32
    %cst_17 = arith.constant 0.000000e+00 : f32
    %32 = vector.broadcast %cst_16 : f32 to vector<32x16xf32>
    %33 = vector.broadcast %cst_17 : f32 to vector<32x16xf32>
    %34 = arith.select %7, %32, %33 : vector<32x16xi1>, vector<32x16xf32>
    %cst_18 = arith.constant dense<0.000000e+00> : vector<16xf32>
    %35 = vector.multi_reduction <add>, %34, %cst_18 [0] : vector<32x16xf32> to vector<16xf32>
    %36 = vector.shape_cast %35 : vector<16xf32> to vector<1x16xf32>
    %c0_19 = arith.constant 0 : index
    %c0_20 = arith.constant 0 : index
    %c0_21 = arith.constant 0 : index
    %37 = vector.load %arg4[%c0_19, %c0_20, %c0_21] : memref<1x1x16xf32, #tpu.memory_space<vmem>>, vector<1x1x16xf32>
    %38 = vector.shape_cast %37 : vector<1x1x16xf32> to vector<1x16xf32>
    %39 = vector.shape_cast %36 : vector<1x16xf32> to vector<1x1x16xf32>
    tpu.vector_store %arg4[%c0_19, %c0_20, %c0_21], %39 {strides = array<i32>} : memref<1x1x16xf32, #tpu.memory_space<vmem>>, vector<1x1x16xf32>,
    return
  }
  func.func @transform_0(%arg0: i32) -> (i32, i32, i32) {
    %c0_i32 = arith.constant 0 : i32
    %c0_i32_0 = arith.constant 0 : i32
    %c0_i32_1 = arith.constant 0 : i32
    return %arg0, %c0_i32, %c0_i32_0 : i32, i32, i32
  }
  func.func @transform_1(%arg0: i32) -> (i32, i32) {
    %c0_i32 = arith.constant 0 : i32
    %c0_i32_0 = arith.constant 0 : i32
    return %arg0, %c0_i32 : i32, i32
  }
  func.func @transform_2(%arg0: i32) -> (i32, i32, i32) {
    %c0_i32 = arith.constant 0 : i32
    %c0_i32_0 = arith.constant 0 : i32
    %c0_i32_1 = arith.constant 0 : i32
    return %arg0, %c0_i32, %c0_i32_0 : i32, i32, i32
  }
  func.func @transform_3(%arg0: i32) -> (i32, i32, i32) {
    %c0_i32 = arith.constant 0 : i32
    %c0_i32_0 = arith.constant 0 : i32
    %c0_i32_1 = arith.constant 0 : i32
    return %arg0, %c0_i32, %c0_i32_0 : i32, i32, i32
  }
}

</mosaic_0001>

<bundles_post_ra>
// kernel: _lambda_.4
= control target key start
LH: loop header
LB: loop body
LE: loop exit
PB: predicated region body
PF: predicated region fallthrough
CT: control target
= control target key end

     0   :  { %vm861_vm0 = vcmask 1041409   ;;  %vm860_vm1 = vcmask 1042434   ;;  %vm859_vm2 = vcmask 1043459   ;;  %vm857_vm3 = vcmask 1044484   ;;  %s850_s0 = inlined_call_operand.vmem [shape: f32[16,2,8], index: 0, kind: input, shape index: {}]   ;;  %s851_s2 = inlined_call_operand.vmem [shape: f32[16,8], index: 2, kind: output, shape index: {0}]   ;;  %s852_s1 = inlined_call_operand.vmem [shape: f32[16,8], index: 1, kind: input, shape index: {}]   ;;  %s853_s4 = inlined_call_operand.vmem [shape: f32[1,1,8], index: 4, kind: output, shape index: {2}]   ;;  %s854_s3 = inlined_call_operand.vmem [shape: f32[1,1,8], index: 3, kind: output, shape index: {1}]  }
   0x1   :  { %v15_v0 = vld [vmem:[%s850_s0 + $0x2] sm:$0x1]  ;;  %v16_v1 = vld [vmem:[%s850_s0 + $0x4] sm:$0x1]  ;;  %v14_v2 = vld [vmem:[%s850_s0] sm:$0x1] }
   0x2   :  { %v17_v3 = vld [vmem:[%s850_s0 + $0x6] sm:$0x1]  ;;  %v18_v4 = vld [vmem:[%s850_s0 + $0x8] sm:$0x1]  ;;  %v19_v5 = vld [vmem:[%s850_s0 + $0xa] sm:$0x1] }
   0x3   :  { %v20_v6 = vld [vmem:[%s850_s0 + $0xc] sm:$0x1]  ;;  %v21_v7 = vld [vmem:[%s850_s0 + $0xe] sm:$0x1]  ;;  %v22_v8 = vld [vmem:[%s850_s0 + $0x10] sm:$0x1] }
   0x4   :  { %v23_v9 = vld [vmem:[%s850_s0 + $0x12] sm:$0x1]  ;;  %v24_v10 = vld [vmem:[%s850_s0 + $0x14] sm:$0x1]  ;;  %v25_v11 = vld [vmem:[%s850_s0 + $0x16] sm:$0x1] }
   0x5   :  { %v26_v12 = vld [vmem:[%s850_s0 + $0x18] sm:$0x1]  ;;  %v30_v13 = vld [vmem:[%s850_s0 + $0x1] sm:$0x1]  ;;  %v31_v14 = vld [vmem:[%s850_s0 + $0x3] sm:$0x1] }
   0x6   :  { %v27_v15 = vld [vmem:[%s850_s0 + $0x1a] sm:$0x1]  ;;  %v28_v16 = vld [vmem:[%s850_s0 + $0x1c] sm:$0x1]  ;;  %v32_v17 = vld [vmem:[%s850_s0 + $0x5] sm:$0x1]  ;;  %v480_v20 = vmax.f32 %v15_v0, %v31_v14  ;;  %v507_v30 = vmax.f32 %v14_v2, %v30_v13 }
   0x7   :  { %v33_v18 = vld [vmem:[%s850_s0 + $0x7] sm:$0x1]  ;;  %v34_v19 = vld [vmem:[%s850_s0 + $0x9] sm:$0x1]  ;;  %v29_v21 = vld [vmem:[%s850_s0 + $0x1e] sm:$0x1]  ;;  %v494_v25 = vmax.f32 %v16_v1, %v32_v17 }
   0x8   :  { %v35_v22 = vld [vmem:[%s850_s0 + $0xb] sm:$0x1]  ;;  %v36_v23 = vld [vmem:[%s850_s0 + $0xd] sm:$0x1]  ;;  %v37_v24 = vld [vmem:[%s850_s0 + $0xf] sm:$0x1]  ;;  %v496_v26 = vmax.f32 %v17_v3, %v33_v18  ;;  %v509_v31 = vmax.f32 %v18_v4, %v34_v19 }
   0x9   :  { %v38_v27 = vld [vmem:[%s850_s0 + $0x11] sm:$0x1]  ;;  %v39_v28 = vld [vmem:[%s850_s0 + $0x13] sm:$0x1]  ;;  %v40_v29 = vld [vmem:[%s850_s0 + $0x15] sm:$0x1]  ;;  %v511_v32 = vmax.f32 %v19_v5, %v35_v22  ;;  %v522_v36 = vmax.f32 %v20_v6, %v36_v23  ;;  %v524_v37 = vmax.f32 %v21_v7, %v37_v24 }
   0xa   :  { %v41_v33 = vld [vmem:[%s850_s0 + $0x17] sm:$0x1]  ;;  %v42_v34 = vld [vmem:[%s850_s0 + $0x19] sm:$0x1]  ;;  %v43_v35 = vld [vmem:[%s850_s0 + $0x1b] sm:$0x1]  ;;  %v526_v38 = vmax.f32 %v22_v8, %v38_v27  ;;  %v528_v39 = vmax.f32 %v23_v9, %v39_v28  ;;  %v536_v42 = vmax.f32 %v24_v10, %v40_v29 }
   0xb   :  { %v44_v40 = vld [vmem:[%s850_s0 + $0x1d] sm:$0x1]  ;;  %v45_v41 = vld [vmem:[%s850_s0 + $0x1f] sm:$0x1]  ;;  %v538_v43 = vmax.f32 %v25_v11, %v41_v33  ;;  %v540_v44 = vmax.f32 %v26_v12, %v42_v34  ;;  %v78_v45 = vrot.slane %v480_v20, 7  ;;  %v543_v46 = vmax.f32 %v27_v15, %v43_v35  ;;  %v118_v11 = vld [vmem:[%s852_s1] sm:$0xff] }
   0xc   :  { %v545_v47 = vmax.f32 %v28_v16, %v44_v40  ;;  %v81_v48 = vrot.slane %v494_v25, 6  ;;  %v84_v49 = vrot.slane %v496_v26, 5  ;;  %v549_v50 = vmax.f32 %v29_v21, %v45_v41  ;;  %v119_v13 = vld [vmem:[%s852_s1 + $0x8] sm:$0xff] }
   0xd   :  { %v80_v51 = vsel %vm861_vm0, %v78_v45, %v507_v30  ;;  %v87_v52 = vrot.slane %v509_v31, 4  ;;  %v90_v53 = vrot.slane %v511_v32, 3  ;;  %vm856_vm4 = vcmask 1045509  }
   0xe   :  { %v83_v54 = vsel %vm860_vm1, %v81_v48, %v80_v51  ;;  %v93_v55 = vrot.slane %v522_v36, 2  ;;  %vm855_vm5 = vcmask 1046534   ;;  %v96_v57 = vrot.slane %v524_v37, 1 }
   0xf   :  { %v86_v56 = vsel %vm859_vm2, %v84_v49, %v83_v54  ;;  %v99_v58 = vrot.slane %v528_v39, 7  ;;  %v101_v59 = vrot.slane %v536_v42, 6  ;;  %vm858_vm6 = vcmask 1047559  }
  0x10   :  { %v89_v60 = vsel %vm857_vm3, %v87_v52, %v86_v56  ;;  %v103_v61 = vrot.slane %v538_v43, 5  ;;  %v105_v62 = vrot.slane %v540_v44, 4  ;;  %v107_v1 = vrot.slane %v543_v46, 3 }
  0x11   :  { %v92_v63 = vsel %vm856_vm4, %v90_v53, %v89_v60  ;;  %v100_v0 = vsel %vm861_vm0, %v99_v58, %v526_v38  ;;  %v109_v4 = vrot.slane %v545_v47, 2  ;;  %v111_v7 = vrot.slane %v549_v50, 1 }
  0x12   :  { %v95_v2 = vsel %vm855_vm5, %v93_v55, %v92_v63  ;;  %v102_v3 = vsel %vm860_vm1, %v101_v59, %v100_v0  ;;  %vm862_vm7 = vcmask 64512   ;;  %vm120_vm8 = vcmp.lt.f32.partialorder %v507_v30, 192.0 }
  0x13   :  { %v98_v5 = vsel %vm858_vm6, %v96_v57, %v95_v2  ;;  %v104_v6 = vsel %vm859_vm2, %v103_v61, %v102_v3  ;;  %vm121_vm9 = vcmp.lt.f32.partialorder %v480_v20, 192.0  ;;  %vm122_vm10 = vcmp.lt.f32.partialorder %v494_v25, 192.0 }
  0x14   :  { %v106_v8 = vsel %vm857_vm3, %v105_v62, %v104_v6  ;;  %116 = vst.msk [vmem:[%s851_s2] sm:$0xff] %vm862_vm7, %v98_v5  ;;  %vm123_vm11 = vcmp.lt.f32.partialorder %v496_v26, 192.0  ;;  %vm124_vm12 = vcmp.lt.f32.partialorder %v509_v31, 192.0  ;;  %vm137_vm2 = vcmp.gt.f32.partialorder %v480_v20, 0.001 }
  0x15   :  { %v108_v9 = vsel %vm856_vm4, %v107_v1, %v106_v8  ;;  %vm138_vm0 = vcmp.gt.f32.partialorder %v494_v25, 0.001  ;;  %vm139_vm15 = vcmp.gt.f32.partialorder %v496_v26, 0.001  ;;  %v168_v15 = vsub.f32 %v118_v11, %v98_v5  ;;  %vm620_vm1 = vmand %vm121_vm9, %vm137_vm2 }
  0x16   :  { %v110_v10 = vsel %vm855_vm5, %v109_v4, %v108_v9  ;;  %vm140_vm3 = vcmp.gt.f32.partialorder %v509_v31, 0.001  ;;  %vm630_vm4 = vmand %vm122_vm10, %vm138_vm0  ;;  %vm146_vm9 = vcmp.gt.f32.partialorder %v536_v42, 0.001  ;;  %vm883_vm14 = vcmp.lt.f32.partialorder %v511_v32, 192.0 }
  0x17   :  { %v112_v12 = vsel %vm858_vm6, %v111_v7, %v110_v10  ;;  %vm136_vm6 = vcmp.gt.f32.partialorder %v507_v30, 0.001  ;;  %vm642_vm13 = vmand %vm123_vm11, %vm139_vm15  ;;  %v170_v21 = vand.u32 2147483647, %v168_v15  ;;  %vm882_vm15 = vcmp.gt.f32.partialorder %v511_v32, 0.001 }
  0x18   :  { %117 = vst.msk [vmem:[%s851_s2 + $0x8] sm:$0xff] %vm862_vm7, %v112_v12  ;;  %vm610_vm5 = vmand %vm120_vm8, %vm136_vm6  ;;  %v169_v17 = vsub.f32 %v119_v13, %v112_v12  ;;  %vm143_vm8 = vcmp.gt.f32.partialorder %v524_v37, 0.001  ;;  %vm145_vm7 = vcmp.gt.f32.partialorder %v528_v39, 0.001  ;;  %v394_v26 = vmov 0.0  }
  0x19   :  { %vm652_vm2 = vmand %vm124_vm12, %vm140_vm3  ;;  %vm886_vm10 = vcmp.gt.f32.partialorder %v522_v36, 0.001  ;;  %vm887_vm3 = vcmp.lt.f32.partialorder %v522_v36, 192.0  ;;  %v172_v25 = vmul.f32 2.0, %v170_v21  ;;  %v299_v27 = vsel %vm610_vm5, 1.0, %v394_v26 }
  0x1a   :  { %vm662_vm0 = vmand %vm883_vm14, %vm882_vm15  ;;  %v171_v23 = vand.u32 2147483647, %v169_v17  ;;  %v300_v28 = vsel %vm620_vm1, 1.0, %v394_v26  ;;  %v301_v29 = vsel %vm630_vm4, 1.0, %v394_v26  ;;  %vm890_vm14 = vcmp.lt.f32.partialorder %v524_v37, 192.0 }
  0x1b   :  { %vm670_vm12 = vmand %vm887_vm3, %vm886_vm10  ;;  %v891_v30 = vmov 0  ;;  %v302_v32 = vsel %vm642_vm13, 1.0, %v394_v26  ;;  %v303_v33 = vsel %vm652_vm2, 1.0, %v394_v26  ;;  %v304_v34 = vsel %vm662_vm0, 1.0, %v394_v26 }
  0x1c   :  { %vm684_vm15 = vmand %vm890_vm14, %vm143_vm8  ;;  %v173_v31 = vmul.f32 2.0, %v171_v23  ;;  %vm893_vm10 = vcmp.gt.f32.partialorder %v526_v38, 0.001  ;;  %vm894_vm3 = vcmp.lt.f32.partialorder %v526_v38, 192.0  ;;  %v895_v35 = vmov 0 }
  0x1d   :  { %v892_v30 = vsel %vm684_vm15, 4294967295, %v891_v30  ;;  %vm698_vm6 = vmand %vm894_vm3, %vm893_vm10  ;;  %v174_v36 = vmul.f32 %v172_v25, %v172_v25  ;;  %v305_v37 = vsel %vm670_vm12, 1.0, %v394_v26  ;;  %v306_v40 = vsel %vm684_vm15, 1.0, %v394_v26 }
  0x1e   :  { %v896_v35 = vsel %vm698_vm6, 4294967295, %v895_v35  ;;  %v331_v41 = vrot.slane %v300_v28, 7  ;;  %vm897_vm8 = vcmp.lt.f32.partialorder %v528_v39, 192.0  ;;  %v898_v45 = vmov 0 }
  0x1f   :  { %vm710_vm14 = vmand %vm897_vm8, %vm145_vm7  ;;  %v175_v38 = vmul.f32 %v173_v31, %v173_v31  ;;  %v307_v48 = vsel %vm698_vm6, 1.0, %v394_v26  ;;  %v333_v49 = vrot.slane %v301_v29, 6  ;;  %v335_v51 = vrot.slane %v302_v32, 5 }
  0x20   :  { %v899_v45 = vsel %vm710_vm14, 4294967295, %v898_v45  ;;  %vm900_vm10 = vcmp.lt.f32.partialorder %v536_v42, 192.0  ;;  %v901_v52 = vmov 0  ;;  %v176_v53 = vmul.f32 0.8333333, %v174_v36 }
  0x21   :  { %vm720_vm3 = vmand %vm900_vm10, %vm146_vm9  ;;  %v308_v39 = vsel %vm710_vm14, 1.0, %v394_v26  ;;  %vm903_vm7 = vcmask 1041409   ;;  %v337_v55 = vrot.slane %v303_v33, 4  ;;  %vm904_vm8 = vcmp.gt.f32.partialorder %v538_v43, 0.001 }
  0x22   :  { %v902_v52 = vsel %vm720_vm3, 4294967295, %v901_v52  ;;  %v332_v54 = vsel %vm903_vm7, %v331_v41, %v299_v27  ;;  %vm905_vm11 = vcmp.lt.f32.partialorder %v538_v43, 192.0  ;;  %v906_v56 = vmov 0 }
  0x23   :  { %vm731_vm6 = vmand %vm905_vm11, %vm904_vm8  ;;  %v177_v42 = vmul.f32 0.8333333, %v175_v38  ;;  %v309_v57 = vsel %vm720_vm3, 1.0, %v394_v26  ;;  %vm908_vm9 = vcmask 1042434   ;;  %v339_v59 = vrot.slane %v304_v34, 3 }
  0x24   :  { %v907_v56 = vsel %vm731_vm6, 4294967295, %v906_v56  ;;  %v334_v58 = vsel %vm908_vm9, %v333_v49, %v332_v54  ;;  %vm909_vm10 = vcmp.gt.f32.partialorder %v540_v44, 0.001  ;;  %vm910_vm7 = vcmp.lt.f32.partialorder %v540_v44, 192.0 }
  0x25   :  { %vm742_vm14 = vmand %vm910_vm7, %vm909_vm10  ;;  %v911_v60 = vmov 0  ;;  %v178_v43 = vadd.f32 1.0, %v176_v53  ;;  %v310_v61 = vsel %vm731_vm6, 1.0, %v394_v26  ;;  %vm913_vm11 = vcmask 1043459  }
  0x26   :  { %v912_v60 = vsel %vm742_vm14, 4294967295, %v911_v60  ;;  %v336_v62 = vsel %vm913_vm11, %v335_v51, %v334_v58  ;;  %v341_v63 = vrot.slane %v305_v37, 2  ;;  %vm914_vm8 = vcmp.gt.f32.partialorder %v543_v46, 0.001 }
  0x27   :  { %vm915_vm9 = vcmp.lt.f32.partialorder %v543_v46, 192.0  ;;  %v916_v0 = vmov 0  ;;  %v179_v44 = vadd.f32 1.0, %v177_v42  ;;  %v311_v1 = vsel %vm742_vm14, 1.0, %v394_v26 }
  0x28   :  { %vm753_vm3 = vmand %vm915_vm9, %vm914_vm8  ;;  %vm918_vm10 = vcmask 1044484   ;;  %v343_v3 = vrot.slane %v306_v40, 1  ;;  %vm919_vm7 = vcmp.gt.f32.partialorder %v545_v47, 0.001  ;;  %vm920_vm11 = vcmp.lt.f32.partialorder %v545_v47, 192.0 }
  0x29   :  { %v917_v0 = vsel %vm753_vm3, 4294967295, %v916_v0  ;;  %v338_v2 = vsel %vm918_vm10, %v337_v55, %v336_v62  ;;  %vm764_vm6 = vmand %vm920_vm11, %vm919_vm7  ;;  %v921_v4 = vmov 0  ;;  %386 = vlog2.f32 %v178_v43 }
  0x2a   :  { %v922_v4 = vsel %vm764_vm6, 4294967295, %v921_v4  ;;  %v312_v46 = vsel %vm753_vm3, 1.0, %v394_v26  ;;  %vm923_vm8 = vcmask 1045509   ;;  %v345_v6 = vrot.slane %v308_v39, 7 }
  0x2b   :  { %v340_v5 = vsel %vm923_vm8, %v339_v59, %v338_v2  ;;  %vm924_vm9 = vcmp.gt.f32.partialorder %v549_v50, 0.001  ;;  %vm925_vm10 = vcmp.lt.f32.partialorder %v549_v50, 192.0  ;;  %v926_v7 = vmov 0 }
  0x2c   :  { %vm775_vm14 = vmand %vm925_vm10, %vm924_vm9  ;;  %388 = vlog2.f32 %v179_v44  ;;  %v313_v47 = vsel %vm764_vm6, 1.0, %v394_v26  ;;  %vm928_vm7 = vcmask 1046534   ;;  %v347_v9 = vrot.slane %v309_v57, 6 }
  0x2d   :  { %v927_v7 = vsel %vm775_vm14, 4294967295, %v926_v7  ;;  %v342_v8 = vsel %vm928_vm7, %v341_v63, %v340_v5  ;;  %v314_v10 = vsel %vm775_vm14, 1.0, %v394_v26  ;;  %vm929_vm11 = vcmask 1041409  }
  0x2e   :  { %v346_v11 = vsel %vm929_vm11, %v345_v6, %v307_v48  ;;  %v349_v12 = vrot.slane %v310_v61, 5  ;;  %vm930_vm8 = vcmask 1042434   ;;  %v351_v50 = vrot.slane %v311_v1, 4 }
  0x2f   :  { %v348_v13 = vsel %vm930_vm8, %v347_v9, %v346_v11  ;;  %v353_v15 = vrot.slane %v312_v46, 3  ;;  %v355_v17 = vrot.slane %v313_v47, 2  ;;  %vm931_vm9 = vcmask 1047559  }
  0x30   :  { %v344_v21 = vsel %vm931_vm9, %v343_v3, %v342_v8  ;;  %vm932_vm10 = vcmask 1043459   ;;  %v357_v25 = vrot.slane %v314_v10, 1  ;;  %vm933_vm6 = vcmask 1044484   ;;  %vm937_vm11 = vmmov %vm931_vm9 }
  0x31   :  { %v350_v23 = vsel %vm932_vm10, %v349_v12, %v348_v13  ;;  %vm934_vm7 = vcmask 1045509   ;;  %vm935_vm3 = vcmask 1046534   ;;  %vm936_vm14 = vcmask 64512   ;;  %vm949_vm9 = vmmov %vm932_vm10 }
  0x32   :  { %v352_v27 = vsel %vm933_vm6, %v351_v50, %v350_v23  ;;  %v361_v26 = vsel %vm936_vm14, %v344_v21, 0.0  ;;  %vm938_vm15 = vmmov %vm936_vm14  ;;  %vm297_vm6 = vcmask 57344   ;;  %vm947_vm14 = vnez %v927_v7 }
  0x33   :  { %v354_v28 = vsel %vm934_vm7, %v353_v15, %v352_v27  ;;  %v387_v33 = vpop.eup %386  ;;  %vm951_vm7 = vcmask 1044484  }
  0x34   :  { %v356_v29 = vsel %vm935_vm3, %v355_v17, %v354_v28  ;;  %v181_v37 = vmul.f32 0.6931472, %v387_v33  ;;  %vm948_vm3 = vcmask 1041409  }
  0x35   :  { %v358_v31 = vsel %vm937_vm11, %v357_v25, %v356_v29  ;;  %vm950_vm10 = vmmov %vm948_vm3 }
  0x36   :  { %v362_v32 = vsel %vm938_vm15, %v358_v31, 0.0  ;;  %v389_v36 = vpop.eup %388  ;;  %v184_v38 = vmul.f32 0.4, %v181_v37  ;;  %vm946_vm15 = vnez %v922_v4  ;;  %vm952_vm11 = vmmov %vm930_vm8 }
  0x37   :  { %v363_v34 = vadd.f32 %v362_v32, %v361_v26  ;;  %v183_v40 = vmul.f32 0.6931472, %v389_v36 }
  0x38   :  { %v186_v51 = vmul.f32 1.442695, %v184_v38 }
  0x39   :  { %v364_v41 = vrot.slane %v363_v34, 4  ;;  %v185_v48 = vmul.f32 0.4, %v183_v40 }
  0x3a   :  { %390 = vpow2.f32 %v186_v51 }
  0x3b   :  { %v365_v49 = vadd.f32 %v364_v41, %v363_v34  ;;  %v188_v53 = vmul.f32 1.442695, %v185_v48 }
  0x3d   :  { %v366_v39 = vrot.slane %v365_v49, 2  ;;  %392 = vpow2.f32 %v188_v53 }
  0x3f   :  { %v367_v54 = vadd.f32 %v366_v39, %v365_v49 }
  0x41   :  { %v368_v55 = vrot.slane %v367_v54, 1 }
  0x43   :  { %v369_v42 = vadd.f32 %v368_v55, %v367_v54 }
  0x44   :  { %v391_v57 = vpop.eup %390 }
  0x45   :  { %370 = vst.msk [vmem:[%s853_s4] sm:$0x1] %vm297_vm6, %v369_v42  ;;  %v383_v59 = vadd.f32 -1.0, %v391_v57 }
  0x47   :  { %v393_v58 = vpop.eup %392  ;;  %v192_v61 = vmul.f32 1.5, %v383_v59 }
  0x48   :  { %v384_v43 = vadd.f32 -1.0, %v393_v58 }
  0x49   :  { %v196_v63 = vrot.slane %v192_v61, 1  ;;  %v197_v44 = vrot.slane %v192_v61, 2  ;;  %v198_v1 = vrot.slane %v192_v61, 3  ;;  %v199_v2 = vrot.slane %v192_v61, 4 }
  0x4a   :  { %v193_v62 = vmul.f32 1.5, %v384_v43  ;;  %v200_v3 = vrot.slane %v192_v61, 5  ;;  %v201_v46 = vrot.slane %v192_v61, 6  ;;  %v202_v5 = vrot.slane %v192_v61, 7 }
  0x4b   :  { %v226_v13 = vsel %vm610_vm5, %v192_v61, 0.0  ;;  %v227_v50 = vsel %vm620_vm1, %v196_v63, 0.0  ;;  %v228_v15 = vsel %vm630_vm4, %v197_v44, 0.0  ;;  %v229_v17 = vsel %vm642_vm13, %v198_v1, 0.0 }
  0x4c   :  { %v203_v6 = vrot.slane %v193_v62, 1  ;;  %v204_v47 = vrot.slane %v193_v62, 2  ;;  %v205_v8 = vrot.slane %v193_v62, 3  ;;  %v206_v9 = vrot.slane %v193_v62, 4 }
  0x4d   :  { %v207_v10 = vrot.slane %v193_v62, 5  ;;  %v208_v11 = vrot.slane %v193_v62, 6  ;;  %v209_v12 = vrot.slane %v193_v62, 7  ;;  %v230_v21 = vsel %vm652_vm2, %v199_v2, 0.0 }
  0x4e   :  { %v231_v23 = vsel %vm662_vm0, %v200_v3, 0.0  ;;  %v232_v25 = vsel %vm670_vm12, %v201_v46, 0.0  ;;  %vm939_vm5 = vnez %v892_v30  ;;  %vm940_vm1 = vnez %v896_v35 }
  0x4f   :  { %v233_v14 = vsel %vm939_vm5, %v202_v5, 0.0  ;;  %v234_v16 = vsel %vm940_vm1, %v193_v62, 0.0  ;;  %vm941_vm4 = vnez %v899_v45  ;;  %vm942_vm13 = vnez %v902_v52  ;;  %vm954_vm1 = vmmov %vm949_vm9 }
  0x50   :  { %v235_v18 = vsel %vm941_vm4, %v203_v6, 0.0  ;;  %v236_v19 = vsel %vm942_vm13, %v204_v47, 0.0  ;;  %vm943_vm2 = vnez %v907_v56  ;;  %vm944_vm0 = vnez %v912_v60  ;;  %vm956_vm13 = vmmov %vm951_vm7 }
  0x51   :  { %v237_v20 = vsel %vm943_vm2, %v205_v8, 0.0  ;;  %v238_v22 = vsel %vm944_vm0, %v206_v9, 0.0  ;;  %vm945_vm12 = vnez %v917_v0  ;;  %v258_v30 = vrot.slane %v227_v50, 7 }
  0x52   :  { %v239_v24 = vsel %vm945_vm12, %v207_v10, 0.0  ;;  %v260_v27 = vrot.slane %v228_v15, 6  ;;  %v240_v35 = vsel %vm946_vm15, %v208_v11, 0.0  ;;  %v241_v45 = vsel %vm947_vm14, %v209_v12, 0.0 }
  0x53   :  { %v262_v28 = vrot.slane %v229_v17, 5  ;;  %v264_v52 = vrot.slane %v230_v21, 4  ;;  %v259_v29 = vsel %vm948_vm3, %v258_v30, %v226_v13  ;;  %v266_v56 = vrot.slane %v231_v23, 3 }
  0x54   :  { %v272_v26 = vrot.slane %v235_v18, 7  ;;  %v274_v31 = vrot.slane %v236_v19, 6  ;;  %v261_v60 = vsel %vm930_vm8, %v260_v27, %v259_v29  ;;  %v268_v32 = vrot.slane %v232_v25, 2 }
  0x55   :  { %v276_v0 = vrot.slane %v237_v20, 5  ;;  %v278_v33 = vrot.slane %v238_v22, 4  ;;  %v263_v34 = vsel %vm949_vm9, %v262_v28, %v261_v60  ;;  %v270_v36 = vrot.slane %v233_v14, 1 }
  0x56   :  { %v273_v4 = vsel %vm950_vm10, %v272_v26, %v234_v16  ;;  %v280_v37 = vrot.slane %v239_v24, 3  ;;  %v265_v7 = vsel %vm951_vm7, %v264_v52, %v263_v34  ;;  %v282_v41 = vrot.slane %v240_v35, 2 }
  0x57   :  { %v275_v40 = vsel %vm952_vm11, %v274_v31, %v273_v4  ;;  %vm953_vm5 = vcmask 1045509   ;;  %v284_v49 = vrot.slane %v241_v45, 1  ;;  %vm955_vm4 = vcmask 1046534  }
  0x58   :  { %v267_v38 = vsel %vm953_vm5, %v266_v56, %v265_v7  ;;  %v277_v48 = vsel %vm954_vm1, %v276_v0, %v275_v40  ;;  %vm957_vm2 = vcmask 1047559   ;;  %vm958_vm0 = vmmov %vm953_vm5  ;;  %vm960_vm15 = vcmask 64512  }
  0x59   :  { %v269_v51 = vsel %vm955_vm4, %v268_v32, %v267_v38  ;;  %v279_v53 = vsel %vm956_vm13, %v278_v33, %v277_v48  ;;  %vm959_vm12 = vmmov %vm955_vm4 }
  0x5a   :  { %v271_v39 = vsel %vm957_vm2, %v270_v36, %v269_v51  ;;  %v281_v54 = vsel %vm958_vm0, %v280_v37, %v279_v53  ;;  %vm961_vm14 = vmmov %vm957_vm2 }
  0x5b   :  { %v283_v55 = vsel %vm959_vm12, %v282_v41, %v281_v54  ;;  %v288_v42 = vsel %vm960_vm15, %v271_v39, 0.0  ;;  %vm962_vm3 = vmmov %vm960_vm15 }
  0x5c   :  { %v285_v57 = vsel %vm961_vm14, %v284_v49, %v283_v55 }
  0x5d   :  { %v289_v58 = vsel %vm962_vm3, %v285_v57, 0.0 }
  0x5e   :  { %v290_v59 = vadd.f32 %v289_v58, %v288_v42 }
  0x60   :  { %v291_v43 = vrot.slane %v290_v59, 4 }
  0x62   :  { %v292_v61 = vadd.f32 %v291_v43, %v290_v59 }
  0x64   :  { %v293_v62 = vrot.slane %v292_v61, 2 }
  0x66   :  { %v294_v63 = vadd.f32 %v293_v62, %v292_v61 }
  0x68   :  { %v295_v44 = vrot.slane %v294_v63, 1 }
  0x6a   :  { %v296_v1 = vadd.f32 %v295_v44, %v294_v63 }
  0x6c   :  { %298 = vst.msk [vmem:[%s854_s3] sm:$0x1] %vm297_vm6, %v296_v1 }

// kernel: _lambda_.5
= control target key start
LH: loop header
LB: loop body
LE: loop exit
PB: predicated region body
PF: predicated region fallthrough
CT: control target
= control target key end

     0   :  { %v403_v30 = vmov 0  ;;  %v215_v45 = vmov 0.0   ;;  %s390_s0 = inlined_call_operand.vmem [shape: f32[8,2,4], index: 0, kind: input, shape index: {}]   ;;  %s391_s1 = inlined_call_operand.vmem [shape: f32[8,4], index: 1, kind: input, shape index: {}]   ;;  %s392_s3 = inlined_call_operand.vmem [shape: f32[1,1,4], index: 3, kind: output, shape index: {1}]   ;;  %s393_s2 = inlined_call_operand.vmem [shape: f32[1,1,4], index: 2, kind: output, shape index: {0}]  }
   0x1   :  { %v13_v0 = vld [vmem:[%s390_s0] sm:$0x1]  ;;  %v14_v1 = vld [vmem:[%s390_s0 + $0x2] sm:$0x1]  ;;  %v15_v2 = vld [vmem:[%s390_s0 + $0x4] sm:$0x1] }
   0x2   :  { %v16_v3 = vld [vmem:[%s390_s0 + $0x6] sm:$0x1]  ;;  %v17_v4 = vld [vmem:[%s390_s0 + $0x8] sm:$0x1]  ;;  %v18_v5 = vld [vmem:[%s390_s0 + $0xa] sm:$0x1] }
   0x3   :  { %v19_v6 = vld [vmem:[%s390_s0 + $0xc] sm:$0x1]  ;;  %v20_v7 = vld [vmem:[%s390_s0 + $0xe] sm:$0x1]  ;;  %v21_v8 = vld [vmem:[%s390_s0 + $0x1] sm:$0x1] }
   0x4   :  { %v22_v9 = vld [vmem:[%s390_s0 + $0x3] sm:$0x1]  ;;  %v23_v10 = vld [vmem:[%s390_s0 + $0x5] sm:$0x1]  ;;  %v24_v11 = vld [vmem:[%s390_s0 + $0x7] sm:$0x1]  ;;  %v29_v12 = vmax.f32 %v13_v0, %v21_v8 }
   0x5   :  { %v25_v13 = vld [vmem:[%s390_s0 + $0x9] sm:$0x1]  ;;  %v26_v14 = vld [vmem:[%s390_s0 + $0xb] sm:$0x1]  ;;  %v27_v15 = vld [vmem:[%s390_s0 + $0xd] sm:$0x1]  ;;  %v30_v16 = vmax.f32 %v14_v1, %v22_v9  ;;  %v31_v18 = vmax.f32 %v15_v2, %v23_v10  ;;  %v32_v19 = vmax.f32 %v16_v3, %v24_v11 }
   0x6   :  { %v28_v17 = vld [vmem:[%s390_s0 + $0xf] sm:$0x1]  ;;  %vm38_vm3 = vcmp.lt.f32.partialorder %v29_v12, 192.0  ;;  %v33_v20 = vmax.f32 %v17_v4, %v25_v13  ;;  %v34_v21 = vmax.f32 %v18_v5, %v26_v14  ;;  %v35_v22 = vmax.f32 %v19_v6, %v27_v15  ;;  %v37_v42 = vld [vmem:[%s391_s1] sm:$0xff] }
   0x7   :  { %vm39_vm5 = vcmp.lt.f32.partialorder %v30_v16, 192.0  ;;  %v36_v23 = vmax.f32 %v20_v7, %v28_v17  ;;  %vm40_vm6 = vcmp.lt.f32.partialorder %v31_v18, 192.0  ;;  %vm46_vm8 = vcmp.gt.f32.partialorder %v29_v12, 0.001 }
   0x8   :  { %vm47_vm10 = vcmp.gt.f32.partialorder %v30_v16, 0.001  ;;  %vm48_vm11 = vcmp.gt.f32.partialorder %v31_v18, 0.001  ;;  %vm284_vm12 = vmand %vm38_vm3, %vm46_vm8  ;;  %v70_v25 = vrot.slane %v30_v16, 7  ;;  %vm401_vm3 = vcmask 1041409  }
   0x9   :  { %vm49_vm15 = vcmp.gt.f32.partialorder %v32_v19, 0.001  ;;  %vm50_vm4 = vcmp.gt.f32.partialorder %v33_v20, 0.001  ;;  %vm288_vm2 = vmand %vm39_vm5, %vm47_vm10  ;;  %vm51_vm0 = vcmp.gt.f32.partialorder %v34_v21, 0.001 }
   0xa   :  { %vm293_vm7 = vmand %vm40_vm6, %vm48_vm11  ;;  %v72_v28 = vsel %vm401_vm3, %v70_v25, %v29_v12  ;;  %v73_v29 = vrot.slane %v31_v18, 6  ;;  %vm52_vm8 = vcmp.gt.f32.partialorder %v35_v22, 0.001  ;;  %vm402_vm9 = vcmp.lt.f32.partialorder %v32_v19, 192.0 }
   0xb   :  { %vm299_vm13 = vmand %vm402_vm9, %vm49_vm15  ;;  %v76_v31 = vrot.slane %v32_v19, 5  ;;  %v79_v32 = vrot.slane %v33_v20, 4  ;;  %v82_v33 = vrot.slane %v34_v21, 3  ;;  %vm53_vm5 = vcmp.gt.f32.partialorder %v36_v23, 0.001 }
   0xc   :  { %v404_v30 = vsel %vm299_vm13, 4294967295, %v403_v30  ;;  %vm405_vm10 = vcmp.lt.f32.partialorder %v33_v20, 192.0  ;;  %vm408_vm6 = vcmask 1042434   ;;  %vm83_vm11 = vcmask 1045509  }
   0xd   :  { %vm304_vm1 = vmand %vm405_vm10, %vm50_vm4  ;;  %v75_v35 = vsel %vm408_vm6, %v73_v29, %v72_v28  ;;  %v85_v36 = vrot.slane %v35_v22, 2  ;;  %vm409_vm3 = vcmp.lt.f32.partialorder %v34_v21, 192.0  ;;  %vm412_vm9 = vcmask 1043459  }
   0xe   :  { %vm311_vm14 = vmand %vm409_vm3, %vm51_vm0  ;;  %v78_v38 = vsel %vm412_vm9, %v76_v31, %v75_v35  ;;  %vm86_vm15 = vcmask 1046534   ;;  %v88_v39 = vrot.slane %v36_v23, 1  ;;  %vm413_vm13 = vcmp.lt.f32.partialorder %v35_v22, 192.0 }
   0xf   :  { %vm318_vm4 = vmand %vm413_vm13, %vm52_vm8  ;;  %vm416_vm10 = vcmask 1044484   ;;  %vm89_vm6 = vcmask 1047559   ;;  %vm417_vm0 = vcmp.lt.f32.partialorder %v36_v23, 192.0  ;;  %v162_v46 = vsel %vm284_vm12, 1.0, %v215_v45 }
  0x10   :  { %v81_v41 = vsel %vm416_vm10, %v79_v32, %v78_v38  ;;  %vm327_vm3 = vmand %vm417_vm0, %vm53_vm5  ;;  %v163_v47 = vsel %vm288_vm2, 1.0, %v215_v45  ;;  %v164_v48 = vsel %vm293_vm7, 1.0, %v215_v45  ;;  %vm420_vm13 = vnez %v404_v30 }
  0x11   :  { %v84_v44 = vsel %vm83_vm11, %v82_v33, %v81_v41  ;;  %v165_v50 = vsel %vm420_vm13, 1.0, %v215_v45  ;;  %v166_v51 = vsel %vm304_vm1, 1.0, %v215_v45  ;;  %v167_v52 = vsel %vm311_vm14, 1.0, %v215_v45 }
  0x12   :  { %v87_v49 = vsel %vm86_vm15, %v85_v36, %v84_v44  ;;  %v168_v54 = vsel %vm318_vm4, 1.0, %v215_v45  ;;  %v169_v55 = vsel %vm327_vm3, 1.0, %v215_v45  ;;  %v178_v56 = vrot.slane %v163_v47, 7 }
  0x13   :  { %v90_v53 = vsel %vm89_vm6, %v88_v39, %v87_v49  ;;  %v180_v58 = vrot.slane %v164_v48, 6  ;;  %v182_v59 = vrot.slane %v165_v50, 5  ;;  %v184_v60 = vrot.slane %v166_v51, 4 }
  0x14   :  { %v92_v57 = vsub.f32 %v37_v42, %v90_v53  ;;  %vm421_vm8 = vcmask 1041409   ;;  %v186_v62 = vrot.slane %v167_v52, 3  ;;  %vm422_vm5 = vcmask 1042434  }
  0x15   :  { %v179_v61 = vsel %vm421_vm8, %v178_v56, %v162_v46  ;;  %v188_v1 = vrot.slane %v168_v54, 2  ;;  %v190_v3 = vrot.slane %v169_v55, 1  ;;  %vm152_vm0 = vcmask 31744  }
  0x16   :  { %v93_v63 = vand.u32 2147483647, %v92_v57  ;;  %v181_v0 = vsel %vm422_vm5, %v180_v58, %v179_v61  ;;  %vm160_vm8 = vcmask 24576  }
  0x17   :  { %v183_v2 = vsel %vm412_vm9, %v182_v59, %v181_v0 }
  0x18   :  { %v94_v4 = vmul.f32 2.0, %v93_v63  ;;  %v185_v5 = vsel %vm416_vm10, %v184_v60, %v183_v2 }
  0x19   :  { %v187_v6 = vsel %vm83_vm11, %v186_v62, %v185_v5 }
  0x1a   :  { %v95_v7 = vmul.f32 %v94_v4, %v94_v4  ;;  %v189_v8 = vsel %vm86_vm15, %v188_v1, %v187_v6 }
  0x1b   :  { %v191_v9 = vsel %vm89_vm6, %v190_v3, %v189_v8 }
  0x1c   :  { %v96_v10 = vmul.f32 0.8333333, %v95_v7  ;;  %v193_v11 = vsel %vm152_vm0, %v191_v9, 0.0 }
  0x1d   :  { %v194_v12 = vrot.slane %v193_v11, 4 }
  0x1e   :  { %v97_v13 = vadd.f32 1.0, %v96_v10 }
  0x1f   :  { %v195_v14 = vadd.f32 %v194_v12, %v193_v11 }
  0x20   :  { %211 = vlog2.f32 %v97_v13 }
  0x21   :  { %v196_v15 = vrot.slane %v195_v14, 2 }
  0x23   :  { %v197_v16 = vadd.f32 %v196_v15, %v195_v14 }
  0x25   :  { %v198_v17 = vrot.slane %v197_v16, 1 }
  0x27   :  { %v199_v18 = vadd.f32 %v198_v17, %v197_v16 }
  0x29   :  { %200 = vst.msk [vmem:[%s392_s3] sm:$0x1] %vm160_vm8, %v199_v18 }
  0x2a   :  { %v212_v19 = vpop.eup %211 }
  0x2b   :  { %v99_v20 = vmul.f32 0.6931472, %v212_v19 }
  0x2d   :  { %v100_v21 = vmul.f32 0.4, %v99_v20 }
  0x2f   :  { %v101_v22 = vmul.f32 1.442695, %v100_v21 }
  0x31   :  { %213 = vpow2.f32 %v101_v22 }
  0x3b   :  { %v214_v23 = vpop.eup %213 }
  0x3c   :  { %v209_v25 = vadd.f32 -1.0, %v214_v23 }
  0x3e   :  { %v104_v28 = vmul.f32 1.5, %v209_v25 }
  0x40   :  { %v106_v29 = vrot.slane %v104_v28, 1  ;;  %v107_v31 = vrot.slane %v104_v28, 2  ;;  %v108_v32 = vrot.slane %v104_v28, 3  ;;  %v109_v33 = vrot.slane %v104_v28, 4 }
  0x41   :  { %v110_v35 = vrot.slane %v104_v28, 5  ;;  %v111_v36 = vrot.slane %v104_v28, 6  ;;  %v112_v38 = vrot.slane %v104_v28, 7  ;;  %v121_v39 = vsel %vm284_vm12, %v104_v28, 0.0  ;;  %vm426_vm12 = vmmov %vm416_vm10 }
  0x42   :  { %v122_v41 = vsel %vm288_vm2, %v106_v29, 0.0  ;;  %v123_v42 = vsel %vm293_vm7, %v107_v31, 0.0  ;;  %v124_v44 = vsel %vm420_vm13, %v108_v32, 0.0  ;;  %v125_v45 = vsel %vm304_vm1, %v109_v33, 0.0  ;;  %vm424_vm7 = vmmov %vm422_vm5 }
  0x43   :  { %v126_v46 = vsel %vm311_vm14, %v110_v35, 0.0  ;;  %v127_v47 = vsel %vm318_vm4, %v111_v36, 0.0  ;;  %v137_v24 = vrot.slane %v122_v41, 7  ;;  %v128_v26 = vsel %vm327_vm3, %v112_v38, 0.0  ;;  %vm425_vm1 = vmmov %vm412_vm9 }
  0x44   :  { %v139_v48 = vrot.slane %v123_v42, 6  ;;  %v141_v49 = vrot.slane %v124_v44, 5  ;;  %v143_v27 = vrot.slane %v125_v45, 4  ;;  %vm423_vm2 = vcmask 1041409  }
  0x45   :  { %v138_v50 = vsel %vm423_vm2, %v137_v24, %v121_v39  ;;  %v145_v30 = vrot.slane %v126_v46, 3  ;;  %v147_v34 = vrot.slane %v127_v47, 2  ;;  %v149_v37 = vrot.slane %v128_v26, 1 }
  0x46   :  { %v140_v51 = vsel %vm424_vm7, %v139_v48, %v138_v50 }
  0x47   :  { %v142_v52 = vsel %vm425_vm1, %v141_v49, %v140_v51 }
  0x48   :  { %v144_v53 = vsel %vm426_vm12, %v143_v27, %v142_v52 }
  0x49   :  { %v146_v40 = vsel %vm83_vm11, %v145_v30, %v144_v53 }
  0x4a   :  { %v148_v54 = vsel %vm86_vm15, %v147_v34, %v146_v40 }
  0x4b   :  { %v150_v43 = vsel %vm89_vm6, %v149_v37, %v148_v54 }
  0x4c   :  { %v153_v55 = vsel %vm152_vm0, %v150_v43, 0.0 }
  0x4d   :  { %v154_v56 = vrot.slane %v153_v55, 4 }
  0x4f   :  { %v155_v57 = vadd.f32 %v154_v56, %v153_v55 }
  0x51   :  { %v156_v58 = vrot.slane %v155_v57, 2 }
  0x53   :  { %v157_v59 = vadd.f32 %v156_v58, %v155_v57 }
  0x55   :  { %v158_v60 = vrot.slane %v157_v59, 1 }
  0x57   :  { %v159_v61 = vadd.f32 %v158_v60, %v157_v59 }
  0x59   :  { %161 = vst.msk [vmem:[%s393_s2] sm:$0x1] %vm160_vm8, %v159_v61 }

// kernel: _lambda_.3
= control target key start
LH: loop header
LB: loop body
LE: loop exit
PB: predicated region body
PF: predicated region fallthrough
CT: control target
= control target key end

     0   :  { %v1249_v10 = vmov 1966171168   ;;  %v184_v22 = vlaneseq  ;;  %v2334_v49 = vmov 0  ;;  %v2336_v52 = vmov 0  ;;  %s2289_s0 = inlined_call_operand.vmem [shape: f32[32,1,16], index: 0, kind: input, shape index: {}]   ;;  %s2290_s1 = inlined_call_operand.vmem [shape: f32[32,16], index: 1, kind: input, shape index: {}]   ;;  %s2291_s3 = inlined_call_operand.vmem [shape: f32[1,1,16], index: 3, kind: output, shape index: {1}]   ;;  %s2292_s2 = inlined_call_operand.vmem [shape: f32[1,1,16], index: 2, kind: output, shape index: {0}]  }
   0x1   :  { %v1274_v0 = vld [vmem:[%s2289_s0] sm:$0x1]  ;;  %v1279_v1 = vld [vmem:[%s2289_s0 + $0x1] sm:$0x1]  ;;  %v1284_v2 = vld [vmem:[%s2289_s0 + $0x2] sm:$0x1]  ;;  %v1321_v11 = vunpack.c.l.s4 %v1249_v10 }
   0x2   :  { %v1289_v3 = vld [vmem:[%s2289_s0 + $0x3] sm:$0x1]  ;;  %v1294_v4 = vld [vmem:[%s2289_s0 + $0x4] sm:$0x1]  ;;  %v1299_v5 = vld [vmem:[%s2289_s0 + $0x5] sm:$0x1]  ;;  %v177_v21 = vcombine.low %v1274_v0, %v1279_v1 }
   0x3   :  { %v1304_v6 = vld [vmem:[%s2289_s0 + $0x6] sm:$0x1]  ;;  %v1309_v7 = vld [vmem:[%s2289_s0 + $0x7] sm:$0x1]  ;;  %v1314_v8 = vld [vmem:[%s2289_s0 + $0x8] sm:$0x1]  ;;  %v178_v26 = vcombine.low %v1284_v2, %v1289_v3  ;;  %v179_v27 = vcombine.low %v1294_v4, %v1299_v5  ;;  %v183_v29 = vunpack.c.0.s8 %v1321_v11 }
   0x4   :  { %v1319_v9 = vld [vmem:[%s2289_s0 + $0x9] sm:$0x1]  ;;  %v1326_v12 = vld [vmem:[%s2289_s0 + $0xa] sm:$0x1]  ;;  %v1331_v13 = vld [vmem:[%s2289_s0 + $0xb] sm:$0x1] }
   0x5   :  { %v1336_v14 = vld [vmem:[%s2289_s0 + $0xc] sm:$0x1]  ;;  %v1341_v15 = vld [vmem:[%s2289_s0 + $0xd] sm:$0x1]  ;;  %v1346_v16 = vld [vmem:[%s2289_s0 + $0xe] sm:$0x1] }
   0x6   :  { %v1351_v17 = vld [vmem:[%s2289_s0 + $0xf] sm:$0x1]  ;;  %v1356_v18 = vld [vmem:[%s2289_s0 + $0x10] sm:$0x1]  ;;  %v1361_v19 = vld [vmem:[%s2289_s0 + $0x11] sm:$0x1] }
   0x7   :  { %v1366_v20 = vld [vmem:[%s2289_s0 + $0x12] sm:$0x1]  ;;  %v1373_v23 = vld [vmem:[%s2289_s0 + $0x13] sm:$0x1]  ;;  %v1378_v24 = vld [vmem:[%s2289_s0 + $0x14] sm:$0x1] }
   0x8   :  { %v1383_v25 = vld [vmem:[%s2289_s0 + $0x15] sm:$0x1]  ;;  %v1395_v30 = vld [vmem:[%s2289_s0 + $0x16] sm:$0x1]  ;;  %v1400_v31 = vld [vmem:[%s2289_s0 + $0x17] sm:$0x1] }
   0x9   :  { %vm49_vm0 = vcmp.lt.f32.partialorder %v1274_v0, 192.0  ;;  %v1412_v35 = vld [vmem:[%s2289_s0 + $0x18] sm:$0x1]  ;;  %v1417_v36 = vld [vmem:[%s2289_s0 + $0x19] sm:$0x1]  ;;  %vm50_vm1 = vcmp.lt.f32.partialorder %v1279_v1, 192.0 }
   0xa   :  { %vm51_vm2 = vcmp.lt.f32.partialorder %v1284_v2, 192.0  ;;  %vm81_vm3 = vcmp.gt.f32.partialorder %v1274_v0, 0.001  ;;  %vm82_vm4 = vcmp.gt.f32.partialorder %v1279_v1, 0.001  ;;  %vm52_vm6 = vcmp.lt.f32.partialorder %v1289_v3, 192.0 }
   0xb   :  { %vm83_vm5 = vcmp.gt.f32.partialorder %v1284_v2, 0.001  ;;  %vm84_vm7 = vcmp.gt.f32.partialorder %v1289_v3, 0.001  ;;  %vm1434_vm8 = vmand %vm49_vm0, %vm81_vm3  ;;  %v1445_v43 = vld [vmem:[%s2289_s0 + $0x1a] sm:$0x1]  ;;  %v2381_v1 = vcombine.low %v1314_v8, %v1319_v9  ;;  %v2382_v3 = vcombine.low %v1326_v12, %v1331_v13 }
   0xc   :  { %v1450_v44 = vld [vmem:[%s2289_s0 + $0x1b] sm:$0x1]  ;;  %vm53_vm9 = vcmp.lt.f32.partialorder %v1294_v4, 192.0  ;;  %vm54_vm10 = vcmp.lt.f32.partialorder %v1299_v5, 192.0  ;;  %vm85_vm11 = vcmp.gt.f32.partialorder %v1294_v4, 0.001  ;;  %vm1457_vm12 = vmand %vm50_vm1, %vm82_vm4 }
   0xd   :  { %v1466_v47 = vld [vmem:[%s2289_s0 + $0x1c] sm:$0x1]  ;;  %v1471_v48 = vld [vmem:[%s2289_s0 + $0x1d] sm:$0x1]  ;;  %vm86_vm0 = vcmp.gt.f32.partialorder %v1299_v5, 0.001  ;;  %vm1481_vm1 = vmand %vm51_vm2, %vm83_vm5  ;;  %v2383_v5 = vcombine.low %v1336_v14, %v1341_v15 }
   0xe   :  { %v2335_v49 = vsel %vm1481_vm1, 4294967295, %v2334_v49  ;;  %v1488_v50 = vld [vmem:[%s2289_s0 + $0x1e] sm:$0x1]  ;;  %v1493_v51 = vld [vmem:[%s2289_s0 + $0x1f] sm:$0x1]  ;;  %vm1503_vm5 = vmand %vm52_vm6, %vm84_vm7  ;;  %v2338_v53 = vmov 0 }
   0xf   :  { %vm87_vm2 = vcmp.gt.f32.partialorder %v1304_v6, 0.001  ;;  %v2337_v52 = vsel %vm1503_vm5, 4294967295, %v2336_v52  ;;  %vm88_vm4 = vcmp.gt.f32.partialorder %v1309_v7, 0.001  ;;  %vm1515_vm15 = vmand %vm53_vm9, %vm85_vm11  ;;  %v2340_v54 = vmov 0 }
  0x10   :  { %v2339_v53 = vsel %vm1515_vm15, 4294967295, %v2338_v53  ;;  %vm1527_vm3 = vmand %vm54_vm10, %vm86_vm0  ;;  %vm2342_vm13 = vcmp.lt.f32.partialorder %v1304_v6, 192.0  ;;  %v2343_v55 = vmov 0  ;;  %vm2345_vm7 = vcmp.lt.f32.partialorder %v1309_v7, 192.0 }
  0x11   :  { %v2341_v54 = vsel %vm1527_vm3, 4294967295, %v2340_v54  ;;  %vm1539_vm14 = vmand %vm2342_vm13, %vm87_vm2  ;;  %v2346_v57 = vmov 0  ;;  %vm2348_vm6 = vcmp.gt.f32.partialorder %v1314_v8, 0.001  ;;  %vm2349_vm0 = vcmp.lt.f32.partialorder %v1314_v8, 192.0 }
  0x12   :  { %v2344_v55 = vsel %vm1539_vm14, 4294967295, %v2343_v55  ;;  %vm1553_vm11 = vmand %vm2345_vm7, %vm88_vm4  ;;  %v2350_v59 = vmov 0  ;;  %vm2352_vm10 = vcmp.gt.f32.partialorder %v1319_v9, 0.001  ;;  %vm2353_vm9 = vcmp.lt.f32.partialorder %v1319_v9, 192.0 }
  0x13   :  { %v2347_v57 = vsel %vm1553_vm11, 4294967295, %v2346_v57  ;;  %vm1567_vm14 = vmand %vm2349_vm0, %vm2348_vm6  ;;  %v2354_v61 = vmov 0  ;;  %v185_v62 = vshrl.u32 %v184_v22, 7  ;;  %vm2357_vm4 = vcmp.gt.f32.partialorder %v1326_v12, 0.001 }
  0x14   :  { %v2351_v59 = vsel %vm1567_vm14, 4294967295, %v2350_v59  ;;  %vm1580_vm2 = vmand %vm2353_vm9, %vm2352_vm10  ;;  %vm2358_vm7 = vcmp.lt.f32.partialorder %v1326_v12, 192.0  ;;  %v2359_v63 = vmov 0  ;;  %v2295_v10 = vmov 0.0  }
  0x15   :  { %v2355_v61 = vsel %vm1580_vm2, 4294967295, %v2354_v61  ;;  %vm1591_vm14 = vmand %vm2358_vm7, %vm2357_vm4  ;;  %v1598_v60 = vsel %vm1434_vm8, 1.0, %v2295_v10  ;;  %v1603_v22 = vsel %vm1457_vm12, 1.0, %v2295_v10  ;;  %v1608_v58 = vsel %vm1481_vm1, 1.0, %v2295_v10 }
  0x16   :  { %2356 = vst [vmem:[#allocation2_spill] sm:$0xff] %v2355_v61  ;;  %v2360_v63 = vsel %vm1591_vm14, 4294967295, %v2359_v63  ;;  %v1613_v56 = vsel %vm1503_vm5, 1.0, %v2295_v10  ;;  %vm2362_vm4 = vcmp.gt.f32.partialorder %v1331_v13, 0.001  ;;  %vm2363_vm7 = vcmp.lt.f32.partialorder %v1331_v13, 192.0 }
  0x17   :  { %2361 = vst [vmem:[#allocation3_spill] sm:$0xff] %v2360_v63  ;;  %vm1621_vm6 = vmand %vm2363_vm7, %vm2362_vm4  ;;  %v2364_v46 = vmov 0  ;;  %v1627_v42 = vsub.s32 %v183_v29, %v185_v62  ;;  %v1632_v41 = vsel %vm1515_vm15, 1.0, %v2295_v10  ;;  %v1637_v39 = vsel %vm1527_vm3, 1.0, %v2295_v10 }
  0x18   :  { %v2365_v46 = vsel %vm1621_vm6, 4294967295, %v2364_v46  ;;  %vm2366_vm4 = vnez %v2344_v55  ;;  %vm2367_vm10 = vcmp.gt.f32.partialorder %v1336_v14, 0.001  ;;  %vm2368_vm0 = vcmp.lt.f32.partialorder %v1336_v14, 192.0 }
  0x19   :  { %v1642_v38 = vsel %vm2366_vm4, 1.0, %v2295_v10  ;;  %vm1650_vm13 = vmand %vm2368_vm0, %vm2367_vm10  ;;  %v2369_v11 = vmov 0  ;;  %v1657_v29 = vsel %vm1553_vm11, 1.0, %v2295_v10  ;;  %vm2371_vm4 = vnez %v2351_v59 }
  0x1a   :  { %v2370_v11 = vsel %vm1650_vm13, 4294967295, %v2369_v11  ;;  %v1662_v62 = vsel %vm2371_vm4, 1.0, %v2295_v10  ;;  %v1667_v37 = vsel %vm1580_vm2, 1.0, %v2295_v10  ;;  %v1672_v34 = vsel %vm1591_vm14, 1.0, %v2295_v10 }
  0x1b   :  { %vm2372_vm7 = vcmp.gt.f32.partialorder %v1341_v15, 0.001  ;;  %vm2373_vm9 = vcmp.lt.f32.partialorder %v1341_v15, 192.0  ;;  %v2374_v33 = vmov 0  ;;  %v187_v32 = vrot.slane %v177_v21, %v1627_v42 }
  0x1c   :  { %vm1680_vm4 = vmand %vm2373_vm9, %vm2372_vm7  ;;  %v194_v10 = vrot.slane %v178_v26, %v1627_v42  ;;  %v201_v28 = vrot.slane %v179_v27, %v1627_v42  ;;  %v2376_v63 = vcombine.low %v1304_v6, %v1309_v7  ;;  %vm2377_vm0 = vcmp.gt.f32.partialorder %v1346_v16, 0.001 }
  0x1d   :  { %v2375_v33 = vsel %vm1680_vm4, 4294967295, %v2374_v33  ;;  %vm2378_vm10 = vcmp.lt.f32.partialorder %v1346_v16, 192.0  ;;  %v236_v2 = vrot.slane %v2381_v1, %v1627_v42  ;;  %v243_v4 = vrot.slane %v2382_v3, %v1627_v42 }
  0x1e   :  { %v208_v61 = vrot.slane %v2376_v63, %v1627_v42  ;;  %vm1706_vm14 = vmand %vm2378_vm10, %vm2377_vm0  ;;  %v250_v6 = vrot.slane %v2383_v5, %v1627_v42  ;;  %v2384_v7 = vcombine.low %v1346_v16, %v1351_v17  ;;  %vm2385_vm9 = vcmp.gt.f32.partialorder %v1351_v17, 0.001  ;;  %v45_v5 = vld [vmem:[%s2290_s1] sm:$0xff] }
  0x1f   :  { %vm2386_vm7 = vcmp.lt.f32.partialorder %v1351_v17, 192.0  ;;  %v209_v9 = vcombine.low %v187_v32, %v194_v10  ;;  %v2389_v13 = vcombine.low %v1356_v18, %v1361_v19  ;;  %v2390_v15 = vcombine.low %v1366_v20, %v1373_v23 }
  0x20   :  { %v257_v21 = vrot.slane %v2384_v7, %v1627_v42  ;;  %vm1732_vm2 = vmand %vm2386_vm7, %vm2385_vm9  ;;  %v210_v12 = vcombine.low %v201_v28, %v208_v61  ;;  %vm2391_vm9 = vcmp.gt.f32.partialorder %v1356_v18, 0.001  ;;  %vm2392_vm7 = vcmp.lt.f32.partialorder %v1356_v18, 192.0 }
  0x21   :  { %v285_v14 = vrot.slane %v2389_v13, %v1627_v42  ;;  %v292_v16 = vrot.slane %v2390_v15, %v1627_v42  ;;  %vm1750_vm11 = vmand %vm2392_vm7, %vm2391_vm9  ;;  %v2393_v17 = vmov 0  ;;  %v258_v26 = vcombine.low %v236_v2, %v243_v4  ;;  %v46_v13 = vld [vmem:[%s2290_s1 + $0x8] sm:$0xff] }
  0x22   :  { %v2394_v17 = vsel %vm1750_vm11, 4294967295, %v2393_v17  ;;  %v259_v27 = vcombine.low %v250_v6, %v257_v21  ;;  %v2395_v28 = vcombine.low %v1378_v24, %v1383_v25  ;;  %v2396_v61 = vcombine.low %v1395_v30, %v1400_v31 }
  0x23   :  { %vm2397_vm9 = vcmp.gt.f32.partialorder %v1361_v19, 0.001  ;;  %vm2398_vm7 = vcmp.lt.f32.partialorder %v1361_v19, 192.0  ;;  %v217_v10 = vrot.slane %v209_v9, %v1627_v42  ;;  %v224_v1 = vrot.slane %v210_v12, %v1627_v42 }
  0x24   :  { %v299_v32 = vrot.slane %v2395_v28, %v1627_v42  ;;  %v306_v63 = vrot.slane %v2396_v61, %v1627_v42  ;;  %vm1768_vm3 = vmand %vm2398_vm7, %vm2397_vm9  ;;  %v307_v2 = vcombine.low %v285_v14, %v292_v16  ;;  %v2401_v3 = vcombine.low %v1412_v35, %v1417_v36 }
  0x25   :  { %vm2402_vm7 = vcmp.gt.f32.partialorder %v1366_v20, 0.001  ;;  %vm2403_vm10 = vcmp.lt.f32.partialorder %v1366_v20, 192.0  ;;  %v2404_v19 = vmov 0  ;;  %v266_v6 = vrot.slane %v258_v26, %v1627_v42 }
  0x26   :  { %v334_v4 = vrot.slane %v2401_v3, %v1627_v42  ;;  %vm1787_vm15 = vmand %vm2403_vm10, %vm2402_vm7  ;;  %v273_v7 = vrot.slane %v259_v27, %v1627_v42  ;;  %v308_v21 = vcombine.low %v299_v32, %v306_v63  ;;  %v2406_v9 = vcombine.low %v1445_v43, %v1450_v44 }
  0x27   :  { %v2405_v19 = vsel %vm1787_vm15, 4294967295, %v2404_v19  ;;  %vm2407_vm7 = vcmp.gt.f32.partialorder %v1373_v23, 0.001  ;;  %vm2408_vm9 = vcmp.lt.f32.partialorder %v1373_v23, 192.0  ;;  %v225_v14 = vcombine.low %v217_v10, %v224_v1 }
  0x28   :  { %v341_v12 = vrot.slane %v2406_v9, %v1627_v42  ;;  %vm1806_vm5 = vmand %vm2408_vm9, %vm2407_vm7  ;;  %v315_v15 = vrot.slane %v307_v2, %v1627_v42  ;;  %v2411_v16 = vcombine.low %v1466_v47, %v1471_v48  ;;  %v2412_v27 = vcombine.low %v1488_v50, %v1493_v51  ;;  %v47_v2 = vld [vmem:[%s2290_s1 + $0x10] sm:$0xff] }
  0x29   :  { %vm2413_vm7 = vcmp.gt.f32.partialorder %v1378_v24, 0.001  ;;  %vm2414_vm10 = vcmp.lt.f32.partialorder %v1378_v24, 192.0  ;;  %v2415_v23 = vmov 0  ;;  %v274_v32 = vcombine.low %v266_v6, %v273_v7 }
  0x2a   :  { %v348_v26 = vrot.slane %v2411_v16, %v1627_v42  ;;  %v355_v28 = vrot.slane %v2412_v27, %v1627_v42  ;;  %vm1825_vm1 = vmand %vm2414_vm10, %vm2413_vm7  ;;  %v322_v61 = vrot.slane %v308_v21, %v1627_v42  ;;  %v356_v63 = vcombine.low %v334_v4, %v341_v12 }
  0x2b   :  { %v2416_v23 = vsel %vm1825_vm1, 4294967295, %v2415_v23  ;;  %v2418_v10 = vmov 0.0   ;;  %vm2419_vm0 = vcmp.gt.f32.partialorder %v1383_v25, 0.001  ;;  %vm2420_vm10 = vcmp.lt.f32.partialorder %v1383_v25, 192.0 }
  0x2c   :  { %2417 = vst [vmem:[#allocation4_spill] sm:$0xff] %v2416_v23  ;;  %v1833_v1 = vsel %vm1621_vm6, 1.0, %v2418_v10  ;;  %vm1842_vm7 = vmand %vm2420_vm10, %vm2419_vm0  ;;  %v2421_v24 = vmov 0  ;;  %v357_v3 = vcombine.low %v348_v26, %v355_v28  ;;  %v377_v6 = vsub.f32 %v45_v5, %v225_v14 }
  0x2d   :  { %v2422_v24 = vsel %vm1842_vm7, 4294967295, %v2421_v24  ;;  %v1849_v4 = vsel %vm1650_vm13, 1.0, %v2418_v10  ;;  %v1854_v7 = vsel %vm1680_vm4, 1.0, %v2418_v10  ;;  %vm2424_vm9 = vcmp.gt.f32.partialorder %v1395_v30, 0.001 }
  0x2e   :  { %2423 = vst [vmem:[#allocation5_spill] sm:$0xff] %v2422_v24  ;;  %vm2425_vm6 = vcmp.lt.f32.partialorder %v1395_v30, 192.0  ;;  %v2426_v25 = vmov 0  ;;  %v323_v21 = vcombine.low %v315_v15, %v322_v61  ;;  %v364_v5 = vrot.slane %v356_v63, %v1627_v42 }
  0x2f   :  { %vm1860_vm0 = vmand %vm2425_vm6, %vm2424_vm9  ;;  %v378_v9 = vsub.f32 %v46_v13, %v274_v32  ;;  %v1868_v12 = vsel %vm1706_vm14, 1.0, %v2418_v10  ;;  %vm2429_vm10 = vcmp.gt.f32.partialorder %v1400_v31, 0.001  ;;  %vm2430_vm4 = vcmp.lt.f32.partialorder %v1400_v31, 192.0  ;;  %v48_v31 = vld [vmem:[%s2290_s1 + $0x18] sm:$0xff] }
  0x30   :  { %v2427_v25 = vsel %vm1860_vm0, 4294967295, %v2426_v25  ;;  %vm1874_vm13 = vmand %vm2430_vm4, %vm2429_vm10  ;;  %v2431_v14 = vmov 0  ;;  %v371_v30 = vrot.slane %v357_v3, %v1627_v42  ;;  %v381_v16 = vand.u32 2147483647, %v377_v6 }
  0x31   :  { %2428 = vst [vmem:[#allocation6_spill] sm:$0xff] %v2427_v25  ;;  %v2432_v14 = vsel %vm1874_vm13, 4294967295, %v2431_v14  ;;  %v1882_v13 = vsel %vm1732_vm2, 1.0, %v2418_v10  ;;  %v1887_v15 = vsel %vm1750_vm11, 1.0, %v2418_v10  ;;  %vm2434_vm6 = vcmp.gt.f32.partialorder %v1412_v35, 0.001 }
  0x32   :  { %2433 = vst [vmem:[#allocation7_spill] sm:$0xff] %v2432_v14  ;;  %vm2435_vm4 = vcmp.lt.f32.partialorder %v1412_v35, 192.0  ;;  %v2436_v26 = vmov 0  ;;  %v379_v27 = vsub.f32 %v47_v2, %v323_v21  ;;  %v382_v28 = vand.u32 2147483647, %v378_v9 }
  0x33   :  { %vm1896_vm9 = vmand %vm2435_vm4, %vm2434_vm6  ;;  %v1903_v32 = vsel %vm1768_vm3, 1.0, %v2418_v10  ;;  %v1908_v61 = vsel %vm1787_vm15, 1.0, %v2418_v10  ;;  %vm2439_vm10 = vcmp.gt.f32.partialorder %v1417_v36, 0.001  ;;  %vm2440_vm11 = vcmp.lt.f32.partialorder %v1417_v36, 192.0  ;;  %v2489_v0 = vld [vmem:[#allocation4_spill] sm:$0xff] }
  0x34   :  { %v2437_v26 = vsel %vm1896_vm9, 4294967295, %v2436_v26  ;;  %vm1914_vm6 = vmand %vm2440_vm11, %vm2439_vm10  ;;  %v2441_v35 = vmov 0  ;;  %v372_v63 = vcombine.low %v364_v5, %v371_v30  ;;  %v385_v2 = vmul.f32 2.0, %v381_v16 }
  0x35   :  { %2438 = vst [vmem:[#allocation8_spill] sm:$0xff] %v2437_v26  ;;  %v2442_v35 = vsel %vm1914_vm6, 4294967295, %v2441_v35  ;;  %v1921_v3 = vsel %vm1806_vm5, 1.0, %v2418_v10  ;;  %v1926_v6 = vsel %vm1825_vm1, 1.0, %v2418_v10  ;;  %vm2444_vm4 = vcmp.gt.f32.partialorder %v1445_v43, 0.001 }
  0x36   :  { %2443 = vst [vmem:[#allocation9_spill] sm:$0xff] %v2442_v35  ;;  %vm2445_vm15 = vcmp.lt.f32.partialorder %v1445_v43, 192.0  ;;  %v2446_v36 = vmov 0  ;;  %v383_v21 = vand.u32 2147483647, %v379_v27  ;;  %v386_v5 = vmul.f32 2.0, %v382_v28 }
  0x37   :  { %vm1932_vm11 = vmand %vm2445_vm15, %vm2444_vm4  ;;  %v1939_v9 = vsel %vm1842_vm7, 1.0, %v2418_v10  ;;  %v1944_v30 = vsel %vm1860_vm0, 1.0, %v2418_v10  ;;  %vm2449_vm10 = vcmp.gt.f32.partialorder %v1450_v44, 0.001  ;;  %vm2450_vm1 = vcmp.lt.f32.partialorder %v1450_v44, 192.0 }
  0x38   :  { %v2447_v36 = vsel %vm1932_vm11, 4294967295, %v2446_v36  ;;  %vm1950_vm15 = vmand %vm2450_vm1, %vm2449_vm10  ;;  %v2451_v43 = vmov 0  ;;  %v380_v16 = vsub.f32 %v48_v31, %v372_v63  ;;  %v389_v27 = vmul.f32 %v385_v2, %v385_v2 }
  0x39   :  { %2448 = vst [vmem:[#allocation10_spill] sm:$0xff] %v2447_v36  ;;  %v2452_v43 = vsel %vm1950_vm15, 4294967295, %v2451_v43  ;;  %v1957_v28 = vsel %vm1874_vm13, 1.0, %v2418_v10  ;;  %v1962_v25 = vsel %vm1896_vm9, 1.0, %v2418_v10  ;;  %vm2454_vm4 = vcmp.gt.f32.partialorder %v1466_v47, 0.001 }
  0x3a   :  { %2453 = vst [vmem:[#allocation11_spill] sm:$0xff] %v2452_v43  ;;  %vm2455_vm0 = vcmp.lt.f32.partialorder %v1466_v47, 192.0  ;;  %v2456_v44 = vmov 0  ;;  %v387_v31 = vmul.f32 2.0, %v383_v21  ;;  %v390_v63 = vmul.f32 %v386_v5, %v386_v5 }
  0x3b   :  { %vm1968_vm1 = vmand %vm2455_vm0, %vm2454_vm4  ;;  %v1975_v2 = vsel %vm1914_vm6, 1.0, %v2418_v10  ;;  %v1980_v26 = vsel %vm1932_vm11, 1.0, %v2418_v10  ;;  %vm2459_vm10 = vcmp.gt.f32.partialorder %v1471_v48, 0.001  ;;  %vm2460_vm9 = vcmp.lt.f32.partialorder %v1471_v48, 192.0 }
  0x3c   :  { %v2457_v44 = vsel %vm1968_vm1, 4294967295, %v2456_v44  ;;  %vm1986_vm0 = vmand %vm2460_vm9, %vm2459_vm10  ;;  %v2461_v47 = vmov 0  ;;  %v384_v21 = vand.u32 2147483647, %v380_v16  ;;  %v393_v5 = vmul.f32 0.8333333, %v389_v27 }
  0x3d   :  { %2458 = vst [vmem:[#allocation12_spill] sm:$0xff] %v2457_v44  ;;  %v2462_v47 = vsel %vm1986_vm0, 4294967295, %v2461_v47  ;;  %v1993_v35 = vsel %vm1950_vm15, 1.0, %v2418_v10  ;;  %v1998_v36 = vsel %vm1968_vm1, 1.0, %v2418_v10  ;;  %vm2464_vm4 = vcmp.gt.f32.partialorder %v1488_v50, 0.001 }
  0x3e   :  { %2463 = vst [vmem:[#allocation13_spill] sm:$0xff] %v2462_v47  ;;  %vm2465_vm11 = vcmp.lt.f32.partialorder %v1488_v50, 192.0  ;;  %v2466_v48 = vmov 0  ;;  %v391_v16 = vmul.f32 %v387_v31, %v387_v31  ;;  %v394_v27 = vmul.f32 0.8333333, %v390_v63 }
  0x3f   :  { %vm2004_vm9 = vmand %vm2465_vm11, %vm2464_vm4  ;;  %v2011_v43 = vsel %vm1986_vm0, 1.0, %v2418_v10  ;;  %v1005_v44 = vcombine.low %v1598_v60, %v1603_v22  ;;  %vm2469_vm10 = vcmp.gt.f32.partialorder %v1493_v51, 0.001  ;;  %vm2470_vm1 = vcmp.lt.f32.partialorder %v1493_v51, 192.0 }
  0x40   :  { %v2467_v48 = vsel %vm2004_vm9, 4294967295, %v2466_v48  ;;  %vm2019_vm15 = vmand %vm2470_vm1, %vm2469_vm10  ;;  %v388_v14 = vmul.f32 2.0, %v384_v21  ;;  %v397_v24 = vadd.f32 1.0, %v393_v5  ;;  %v971_v31 = vsel %vm2004_vm9, 1.0, %v2418_v10 }
  0x41   :  { %2468 = vst [vmem:[#allocation14_spill] sm:$0xff] %v2467_v48  ;;  %v1006_v63 = vcombine.low %v1608_v58, %v1613_v56  ;;  %v395_v47 = vmul.f32 0.8333333, %v391_v16  ;;  %v398_v23 = vadd.f32 1.0, %v394_v27  ;;  %v972_v60 = vsel %vm2019_vm15, 1.0, %v2418_v10 }
  0x42   :  { %v1007_v51 = vcombine.low %v1632_v41, %v1637_v39  ;;  %v392_v22 = vmul.f32 %v388_v14, %v388_v14  ;;  %1233 = vlog2.f32 %v397_v24  ;;  %v1008_v21 = vcombine.low %v1642_v38, %v1657_v29 }
  0x43   :  { %v1015_v5 = vrot.slane %v1005_v44, %v1627_v42  ;;  %v399_v48 = vadd.f32 1.0, %v395_v47  ;;  %1235 = vlog2.f32 %v398_v23  ;;  %v1022_v56 = vrot.slane %v1006_v63, %v1627_v42 }
  0x44   :  { %v1029_v58 = vrot.slane %v1007_v51, %v1627_v42  ;;  %v396_v16 = vmul.f32 0.8333333, %v392_v22  ;;  %vm2329_vm11 = vcmask 130048   ;;  %v1036_v10 = vrot.slane %v1008_v21, %v1627_v42 }
  0x45   :  { %v1054_v39 = vcombine.low %v1662_v62, %v1667_v37  ;;  %v1055_v41 = vcombine.low %v1672_v34, %v1833_v1  ;;  %1237 = vlog2.f32 %v399_v48  ;;  %v1037_v38 = vcombine.low %v1015_v5, %v1022_v56 }
  0x46   :  { %v1056_v29 = vcombine.low %v1849_v4, %v1854_v7  ;;  %v1057_v23 = vcombine.low %v1868_v12, %v1882_v13  ;;  %v400_v24 = vadd.f32 1.0, %v396_v16  ;;  %v1038_v14 = vcombine.low %v1029_v58, %v1036_v10 }
  0x47   :  { %v1064_v44 = vrot.slane %v1054_v39, %v1627_v42  ;;  %v1071_v47 = vrot.slane %v1055_v41, %v1627_v42  ;;  %v1045_v27 = vrot.slane %v1037_v38, %v1627_v42  ;;  %v1103_v62 = vcombine.low %v1887_v15, %v1903_v32 }
  0x48   :  { %v1078_v37 = vrot.slane %v1056_v29, %v1627_v42  ;;  %v1085_v34 = vrot.slane %v1057_v23, %v1627_v42  ;;  %1239 = vlog2.f32 %v400_v24  ;;  %v1052_v1 = vrot.slane %v1038_v14, %v1627_v42 }
  0x49   :  { %v1086_v4 = vcombine.low %v1064_v44, %v1071_v47  ;;  %v1104_v7 = vcombine.low %v1908_v61, %v1921_v3  ;;  %v1105_v13 = vcombine.low %v1926_v6, %v1939_v9  ;;  %v1106_v48 = vcombine.low %v1944_v30, %v1957_v28 }
  0x4a   :  { %v1087_v12 = vcombine.low %v1078_v37, %v1085_v34  ;;  %v1113_v63 = vrot.slane %v1103_v62, %v1627_v42  ;;  %v1053_v51 = vcombine.low %v1045_v27, %v1052_v1  ;;  %v1152_v32 = vcombine.low %v1962_v25, %v1975_v2 }
  0x4b   :  { %v1094_v22 = vrot.slane %v1086_v4, %v1627_v42  ;;  %v1120_v15 = vrot.slane %v1104_v7, %v1627_v42  ;;  %v1127_v61 = vrot.slane %v1105_v13, %v1627_v42  ;;  %v1134_v3 = vrot.slane %v1106_v48, %v1627_v42 }
  0x4c   :  { %v1101_v21 = vrot.slane %v1087_v12, %v1627_v42  ;;  %v1153_v6 = vcombine.low %v1980_v26, %v1993_v35  ;;  %v1234_v9 = vpop.eup %1233  ;;  %v1154_v28 = vcombine.low %v1998_v36, %v2011_v43  ;;  %v1155_v5 = vcombine.low %v971_v31, %v972_v60 }
  0x4d   :  { %v1135_v30 = vcombine.low %v1113_v63, %v1120_v15  ;;  %v1162_v56 = vrot.slane %v1152_v32, %v1627_v42  ;;  %v1236_v58 = vpop.eup %1235  ;;  %v402_v16 = vmul.f32 0.6931472, %v1234_v9  ;;  %v1136_v2 = vcombine.low %v1127_v61, %v1134_v3 }
  0x4e   :  { %v1102_v25 = vcombine.low %v1094_v22, %v1101_v21  ;;  %v1169_v10 = vrot.slane %v1153_v6, %v1627_v42  ;;  %v404_v39 = vmul.f32 0.6931472, %v1236_v58  ;;  %v1176_v38 = vrot.slane %v1154_v28, %v1627_v42 }
  0x4f   :  { %v1143_v41 = vrot.slane %v1135_v30, %v1627_v42  ;;  %v1183_v26 = vrot.slane %v1155_v5, %v1627_v42  ;;  %v1238_v35 = vpop.eup %1237  ;;  %v409_v29 = vmul.f32 0.4, %v402_v16  ;;  %v1150_v36 = vrot.slane %v1136_v2, %v1627_v42 }
  0x50   :  { %v1184_v43 = vcombine.low %v1162_v56, %v1169_v10  ;;  %v1205_v31 = vsel %vm2329_vm11, %v1053_v51, 0.0  ;;  %v406_v60 = vmul.f32 0.6931472, %v1238_v35  ;;  %v410_v23 = vmul.f32 0.4, %v404_v39 }
  0x51   :  { %v1185_v24 = vcombine.low %v1176_v38, %v1183_v26  ;;  %v1206_v14 = vsel %vm2329_vm11, %v1102_v25, 0.0  ;;  %v413_v44 = vmul.f32 1.442695, %v409_v29  ;;  %v1151_v47 = vcombine.low %v1143_v41, %v1150_v36 }
  0x52   :  { %v1192_v27 = vrot.slane %v1184_v43, %v1627_v42  ;;  %v1207_v37 = vadd.f32 %v1206_v14, %v1205_v31  ;;  %v1240_v34 = vpop.eup %1239  ;;  %v411_v62 = vmul.f32 0.4, %v406_v60  ;;  %v415_v1 = vmul.f32 1.442695, %v410_v23 }
  0x53   :  { %v1199_v4 = vrot.slane %v1185_v24, %v1627_v42  ;;  %v408_v7 = vmul.f32 0.6931472, %v1240_v34  ;;  %1241 = vpow2.f32 %v413_v44  ;;  %v1208_v12 = vsel %vm2329_vm11, %v1151_v47, 0.0 }
  0x54   :  { %1243 = vpow2.f32 %v415_v1  ;;  %v417_v13 = vmul.f32 1.442695, %v411_v62  ;;  %v1209_v63 = vadd.f32 %v1208_v12, %v1207_v37  ;;  %vm2328_vm1 = vcmask 122880  }
  0x55   :  { %v1200_v48 = vcombine.low %v1192_v27, %v1199_v4  ;;  %v412_v51 = vmul.f32 0.4, %v408_v7  ;;  %vm2475_vm4 = vnez %v2339_v53  ;;  %vm2476_vm10 = vnez %v2341_v54  ;;  %v2480_v53 = vld [vmem:[#allocation2_spill] sm:$0xff] }
  0x56   :  { %1245 = vpow2.f32 %v417_v13 }
  0x57   :  { %v1210_v22 = vsel %vm2329_vm11, %v1200_v48, 0.0  ;;  %v419_v15 = vmul.f32 1.442695, %v412_v51 }
  0x58   :  { %v1211_v32 = vadd.f32 %v1210_v22, %v1209_v63 }
  0x59   :  { %1247 = vpow2.f32 %v419_v15 }
  0x5a   :  { %v1212_v21 = vrot.slane %v1211_v32, 4 }
  0x5c   :  { %v1213_v61 = vadd.f32 %v1212_v21, %v1211_v32 }
  0x5d   :  { %v1242_v3 = vpop.eup %1241 }
  0x5e   :  { %v1214_v6 = vrot.slane %v1213_v61, 2  ;;  %v1244_v9 = vpop.eup %1243  ;;  %v1227_v30 = vadd.f32 -1.0, %v1242_v3 }
  0x5f   :  { %v1228_v28 = vadd.f32 -1.0, %v1244_v9 }
  0x60   :  { %v1215_v5 = vadd.f32 %v1214_v6, %v1213_v61  ;;  %v1246_v56 = vpop.eup %1245  ;;  %v425_v58 = vmul.f32 1.5, %v1227_v30 }
  0x61   :  { %v1229_v16 = vadd.f32 -1.0, %v1246_v56  ;;  %v426_v25 = vmul.f32 1.5, %v1228_v28 }
  0x62   :  { %v1216_v2 = vrot.slane %v1215_v5, 1  ;;  %v433_v10 = vcombine.high %v425_v58, %v425_v58  ;;  %v440_v39 = vrot.slane %v425_v58, %v1627_v42 }
  0x63   :  { %v1248_v41 = vpop.eup %1247  ;;  %v427_v38 = vmul.f32 1.5, %v1229_v16  ;;  %v482_v26 = vcombine.high %v426_v25, %v426_v25  ;;  %v489_v35 = vrot.slane %v426_v25, %v1627_v42 }
  0x64   :  { %v1217_v29 = vadd.f32 %v1216_v2, %v1215_v5  ;;  %v1230_v36 = vadd.f32 -1.0, %v1248_v41  ;;  %v447_v43 = vrot.slane %v433_v10, %v1627_v42  ;;  %v448_v31 = vcombine.high %v440_v39, %v440_v39 }
  0x65   :  { %v2089_v60 = vrot.slane %v440_v39, %v1627_v42  ;;  %v496_v23 = vrot.slane %v482_v26, %v1627_v42  ;;  %v497_v24 = vcombine.high %v489_v35, %v489_v35  ;;  %v2093_v14 = vrot.slane %v489_v35, %v1627_v42 }
  0x66   :  { %v531_v44 = vcombine.high %v427_v38, %v427_v38  ;;  %1218 = vst.msk [vmem:[%s2291_s3] sm:$0x1] %vm2328_vm1, %v1217_v29  ;;  %v428_v47 = vmul.f32 1.5, %v1230_v36  ;;  %v449_v27 = vcombine.high %v447_v43, %v447_v43  ;;  %v2100_v37 = vrot.slane %v447_v43, %v1627_v42 }
  0x67   :  { %v2103_v34 = vrot.slane %v448_v31, %v1627_v42  ;;  %v478_v62 = vcombine.high %v2089_v60, %v2089_v60  ;;  %v498_v1 = vcombine.high %v496_v23, %v496_v23  ;;  %v2108_v4 = vrot.slane %v496_v23, %v1627_v42 }
  0x68   :  { %v2111_v7 = vrot.slane %v497_v24, %v1627_v42  ;;  %v2114_v12 = vrot.slane %v449_v27, %v1627_v42  ;;  %v479_v13 = vcombine.high %v2100_v37, %v2100_v37  ;;  %v527_v63 = vcombine.high %v2093_v14, %v2093_v14 }
  0x69   :  { %v480_v48 = vcombine.high %v2103_v34, %v2103_v34  ;;  %v2123_v51 = vrot.slane %v498_v1, %v1627_v42  ;;  %v528_v22 = vcombine.high %v2108_v4, %v2108_v4  ;;  %v538_v32 = vrot.slane %v427_v38, %v1627_v42  ;;  %v2482_v1 = vld [vmem:[#allocation3_spill] sm:$0xff] }
  0x6a   :  { %v529_v15 = vcombine.high %v2111_v7, %v2111_v7  ;;  %v481_v21 = vcombine.high %v2114_v12, %v2114_v12  ;;  %v545_v61 = vrot.slane %v531_v44, %v1627_v42  ;;  %v580_v3 = vcombine.high %v428_v47, %v428_v47 }
  0x6b   :  { %v587_v6 = vrot.slane %v428_v47, %v1627_v42  ;;  %v530_v9 = vcombine.high %v2123_v51, %v2123_v51  ;;  %v546_v30 = vcombine.high %v538_v32, %v538_v32  ;;  %v2137_v28 = vrot.slane %v538_v32, %v1627_v42 }
  0x6c   :  { %v661_v5 = vsel %vm1434_vm8, %v2089_v60, 0.0  ;;  %v547_v56 = vcombine.high %v545_v61, %v545_v61  ;;  %v2143_v58 = vrot.slane %v545_v61, %v1627_v42  ;;  %v594_v16 = vrot.slane %v580_v3, %v1627_v42  ;;  %v2502_v3 = vld [vmem:[#allocation12_spill] sm:$0xff] }
  0x6d   :  { %v595_v25 = vcombine.high %v587_v6, %v587_v6  ;;  %v2147_v2 = vrot.slane %v546_v30, %v1627_v42  ;;  %v576_v10 = vcombine.high %v2137_v28, %v2137_v28  ;;  %v2152_v39 = vrot.slane %v587_v6, %v1627_v42 }
  0x6e   :  { %v662_v40 = vsel %vm1457_vm12, %v2103_v34, 0.0  ;;  %v2158_v41 = vrot.slane %v547_v56, %v1627_v42  ;;  %v577_v38 = vcombine.high %v2143_v58, %v2143_v58  ;;  %v596_v26 = vcombine.high %v594_v16, %v594_v16 }
  0x6f   :  { %v2163_v35 = vrot.slane %v594_v16, %v1627_v42  ;;  %v578_v29 = vcombine.high %v2147_v2, %v2147_v2  ;;  %v2168_v36 = vrot.slane %v595_v25, %v1627_v42  ;;  %v625_v45 = vcombine.high %v2152_v39, %v2152_v39 }
  0x70   :  { %vm2473_vm8 = vnez %v2335_v49  ;;  %v579_v31 = vcombine.high %v2158_v41, %v2158_v41  ;;  %v2177_v60 = vrot.slane %v596_v26, %v1627_v42  ;;  %vm2474_vm12 = vnez %v2337_v52 }
  0x71   :  { %v663_v43 = vsel %vm2473_vm8, %v478_v62, 0.0  ;;  %v626_v23 = vcombine.high %v2163_v35, %v2163_v35  ;;  %v664_v24 = vsel %vm2474_vm12, %v480_v48, 0.0  ;;  %v627_v44 = vcombine.high %v2168_v36, %v2168_v36 }
  0x72   :  { %v665_v49 = vsel %vm2475_vm4, %v2100_v37, 0.0  ;;  %v666_v47 = vsel %vm2476_vm10, %v2114_v12, 0.0  ;;  %vm2477_vm8 = vnez %v2344_v55  ;;  %v628_v34 = vcombine.high %v2177_v60, %v2177_v60 }
  0x73   :  { %v667_v27 = vsel %vm2477_vm8, %v479_v13, 0.0  ;;  %vm2478_vm1 = vnez %v2347_v57  ;;  %vm2479_vm12 = vnez %v2351_v59  ;;  %vm2481_vm4 = vnez %v2480_v53 }
  0x74   :  { %v668_v52 = vsel %vm2478_vm1, %v481_v21, 0.0  ;;  %v669_v62 = vsel %vm2479_vm12, %v2093_v14, 0.0  ;;  %v670_v37 = vsel %vm2481_vm4, %v2111_v7, 0.0  ;;  %vm2483_vm11 = vnez %v2482_v1  ;;  %v2500_v21 = vld [vmem:[#allocation11_spill] sm:$0xff] }
  0x75   :  { %v671_v54 = vsel %vm2483_vm11, %v527_v63, 0.0  ;;  %vm2484_vm10 = vnez %v2365_v46  ;;  %vm2485_vm8 = vnez %v2370_v11  ;;  %vm2486_vm1 = vnez %v2375_v33 }
  0x76   :  { %v672_v55 = vsel %vm2484_vm10, %v529_v15, 0.0  ;;  %v673_v12 = vsel %vm2485_vm8, %v2108_v4, 0.0  ;;  %v674_v57 = vsel %vm2486_vm1, %v2123_v51, 0.0  ;;  %v675_v59 = vsel %vm1706_vm14, %v528_v22, 0.0  ;;  %v2498_v15 = vld [vmem:[#allocation10_spill] sm:$0xff] }
  0x77   :  { %v676_v14 = vsel %vm1732_vm2, %v530_v9, 0.0  ;;  %vm2487_vm11 = vnez %v2394_v17  ;;  %v678_v46 = vsel %vm1768_vm3, %v2147_v2, 0.0  ;;  %vm2488_vm12 = vnez %v2405_v19  ;;  %v2492_v17 = vld [vmem:[#allocation6_spill] sm:$0xff]  ;;  %v2495_v19 = vld [vmem:[#allocation8_spill] sm:$0xff] }
  0x78   :  { %v677_v7 = vsel %vm2487_vm11, %v2137_v28, 0.0  ;;  %v679_v11 = vsel %vm2488_vm12, %v576_v10, 0.0  ;;  %v680_v33 = vsel %vm1806_vm5, %v578_v29, 0.0  ;;  %vm2490_vm14 = vnez %v2489_v0 }
  0x79   :  { %v681_v4 = vsel %vm2490_vm14, %v2143_v58, 0.0  ;;  %v682_v13 = vsel %vm1842_vm7, %v2158_v41, 0.0  ;;  %vm2493_vm2 = vnez %v2492_v17  ;;  %v684_v18 = vsel %vm1874_vm13, %v579_v31, 0.0 }
  0x7a   :  { %v683_v48 = vsel %vm2493_vm2, %v577_v38, 0.0  ;;  %vm2496_vm3 = vnez %v2495_v19  ;;  %v686_v22 = vsel %vm1914_vm6, %v2168_v36, 0.0  ;;  %vm2499_vm5 = vnez %v2498_v15 }
  0x7b   :  { %v685_v51 = vsel %vm2496_vm3, %v2152_v39, 0.0  ;;  %v687_v32 = vsel %vm2499_vm5, %v625_v45, 0.0  ;;  %vm2501_vm4 = vnez %v2500_v21  ;;  %vm2503_vm7 = vnez %v2502_v3 }
  0x7c   :  { %v688_v61 = vsel %vm2501_vm4, %v627_v44, 0.0  ;;  %v689_v6 = vsel %vm2503_vm7, %v2163_v35, 0.0  ;;  %v690_v30 = vsel %vm1986_vm0, %v2177_v60, 0.0  ;;  %v691_v56 = vsel %vm2004_vm9, %v626_v23, 0.0 }
  0x7d   :  { %v692_v58 = vsel %vm2019_vm15, %v628_v34, 0.0  ;;  %v725_v16 = vcombine.low %v661_v5, %v662_v40  ;;  %v726_v25 = vcombine.low %v663_v43, %v664_v24  ;;  %v727_v2 = vcombine.low %v665_v49, %v666_v47 }
  0x7e   :  { %v728_v10 = vcombine.low %v667_v27, %v668_v52  ;;  %v774_v39 = vcombine.low %v669_v62, %v670_v37  ;;  %v775_v41 = vcombine.low %v671_v54, %v672_v55  ;;  %v776_v35 = vcombine.low %v673_v12, %v674_v57 }
  0x7f   :  { %v735_v38 = vrot.slane %v725_v16, %v1627_v42  ;;  %v742_v26 = vrot.slane %v726_v25, %v1627_v42  ;;  %v777_v29 = vcombine.low %v675_v59, %v676_v14  ;;  %v749_v36 = vrot.slane %v727_v2, %v1627_v42 }
  0x80   :  { %v756_v45 = vrot.slane %v728_v10, %v1627_v42  ;;  %v784_v31 = vrot.slane %v774_v39, %v1627_v42  ;;  %v791_v50 = vrot.slane %v775_v41, %v1627_v42  ;;  %v798_v40 = vrot.slane %v776_v35, %v1627_v42 }
  0x81   :  { %v757_v5 = vcombine.low %v735_v38, %v742_v26  ;;  %v805_v43 = vrot.slane %v777_v29, %v1627_v42  ;;  %v823_v60 = vcombine.low %v677_v7, %v678_v46  ;;  %v824_v44 = vcombine.low %v679_v11, %v680_v33 }
  0x82   :  { %v758_v23 = vcombine.low %v749_v36, %v756_v45  ;;  %v806_v24 = vcombine.low %v784_v31, %v791_v50  ;;  %v825_v49 = vcombine.low %v681_v4, %v682_v13  ;;  %v826_v34 = vcombine.low %v683_v48, %v684_v18 }
  0x83   :  { %v765_v47 = vrot.slane %v757_v5, %v1627_v42  ;;  %v807_v27 = vcombine.low %v798_v40, %v805_v43  ;;  %v833_v52 = vrot.slane %v823_v60, %v1627_v42  ;;  %v840_v37 = vrot.slane %v824_v44, %v1627_v42 }
  0x84   :  { %v772_v62 = vrot.slane %v758_v23, %v1627_v42  ;;  %v814_v53 = vrot.slane %v806_v24, %v1627_v42  ;;  %v847_v1 = vrot.slane %v825_v49, %v1627_v42  ;;  %v854_v55 = vrot.slane %v826_v34, %v1627_v42 }
  0x85   :  { %v821_v54 = vrot.slane %v807_v27, %v1627_v42  ;;  %v872_v12 = vcombine.low %v685_v51, %v686_v22  ;;  %v873_v57 = vcombine.low %v687_v32, %v688_v61  ;;  %v855_v14 = vcombine.low %v833_v52, %v840_v37 }
  0x86   :  { %v773_v59 = vcombine.low %v765_v47, %v772_v62  ;;  %v874_v7 = vcombine.low %v689_v6, %v690_v30  ;;  %v875_v46 = vcombine.low %v691_v56, %v692_v58  ;;  %v856_v33 = vcombine.low %v847_v1, %v854_v55 }
  0x87   :  { %v822_v11 = vcombine.low %v814_v53, %v821_v54  ;;  %v882_v0 = vrot.slane %v872_v12, %v1627_v42  ;;  %v889_v4 = vrot.slane %v873_v57, %v1627_v42  ;;  %v863_v8 = vrot.slane %v855_v14, %v1627_v42 }
  0x88   :  { %v896_v13 = vrot.slane %v874_v7, %v1627_v42  ;;  %v903_v17 = vrot.slane %v875_v46, %v1627_v42  ;;  %vm2506_vm13 = vcmask 130048   ;;  %v870_v63 = vrot.slane %v856_v33, %v1627_v42 }
  0x89   :  { %v926_v48 = vsel %vm2506_vm13, %v773_v59, 0.0  ;;  %v904_v18 = vcombine.low %v882_v0, %v889_v4  ;;  %vm2507_vm6 = vmmov %vm2506_vm13  ;;  %vm2510_vm9 = vcmask 122880  }
  0x8a   :  { %v927_v19 = vsel %vm2507_vm6, %v822_v11, 0.0  ;;  %v905_v51 = vcombine.low %v896_v13, %v903_v17  ;;  %v871_v22 = vcombine.low %v863_v8, %v870_v63  ;;  %vm2508_vm15 = vmmov %vm2507_vm6 }
  0x8b   :  { %v928_v20 = vadd.f32 %v927_v19, %v926_v48  ;;  %v912_v15 = vrot.slane %v904_v18, %v1627_v42  ;;  %vm2509_vm0 = vmmov %vm2507_vm6 }
  0x8c   :  { %v919_v32 = vrot.slane %v905_v51, %v1627_v42  ;;  %v929_v21 = vsel %vm2508_vm15, %v871_v22, 0.0 }
  0x8d   :  { %v930_v3 = vadd.f32 %v929_v21, %v928_v20 }
  0x8e   :  { %v920_v61 = vcombine.low %v912_v15, %v919_v32 }
  0x90   :  { %v931_v6 = vsel %vm2509_vm0, %v920_v61, 0.0 }
  0x91   :  { %v932_v9 = vadd.f32 %v931_v6, %v930_v3 }
  0x93   :  { %v933_v30 = vrot.slane %v932_v9, 4 }
  0x95   :  { %v934_v28 = vadd.f32 %v933_v30, %v932_v9 }
  0x97   :  { %v935_v56 = vrot.slane %v934_v28, 2 }
  0x99   :  { %v936_v58 = vadd.f32 %v935_v56, %v934_v28 }
  0x9b   :  { %v937_v16 = vrot.slane %v936_v58, 1 }
  0x9d   :  { %v938_v25 = vadd.f32 %v937_v16, %v936_v58 }
  0x9f   :  { %940 = vst.msk [vmem:[%s2292_s2] sm:$0x1] %vm2510_vm9, %v938_v25 }

</bundles_post_ra>
